<compile_context>
chip_gen: v7x
topology: tpu7x:2x2x1
jax: 0.10.0
libtpu: 0.0.40
codegen_flags: <defaults>
</compile_context>

<pallas_src>
import functools

import jax
import jax.numpy as jnp
from jax import lax
from jax.experimental import pallas as pl
from jax.experimental.pallas import tpu as pltpu

DROPOUT = 0.2
EMBED_DIM = 384               # matches the PyTorch module
HIDDEN_DIM = 4 * EMBED_DIM
_KEEP_SCALE = 1.0 / (1.0 - DROPOUT)
_DROP_THRESH = int(DROPOUT * 4294967296.0)   # drop iff hash_bits < p * 2^32


def _hash_u32(x):
    """splitmix32-style avalanche hash on uint32 vectors (pure VPU ops)."""
    x = x * jnp.uint32(0x9E3779B9)
    x = (x ^ (x >> 16)) * jnp.uint32(0x7FEB352D)
    x = (x ^ (x >> 15)) * jnp.uint32(0x846CA68B)
    return x ^ (x >> 16)


def _ffn_kernel(seed_ref, x_ref, w1_ref, b1_ref, w2_ref, b2_ref, o_ref,
                *, apply_dropout, block_rows):
    # x_ref: (TM, D) f32   w1_ref: (D, 4D) bf16   b1_ref: (1, 4D) f32
    # w2_ref: (4D, D) bf16 b2_ref: (1, D) f32     o_ref: (TM, D) f32
    x = x_ref[...].astype(jnp.bfloat16)

    # Linear 1 + ReLU: bf16 operands on the MXU, f32 accumulate + f32 epilogue.
    h = jnp.dot(x, w1_ref[...], preferred_element_type=jnp.float32) + b1_ref[...]
    h = jnp.maximum(h, 0.0)

    # Linear 2
    y = jnp.dot(h.astype(jnp.bfloat16), w2_ref[...],
                preferred_element_type=jnp.float32) + b2_ref[...]

    if apply_dropout:
        # Counter-based PRNG: hash(global element index ^ seed).  Distinct mask
        # per tile (global index includes program_id offset), no pltpu.prng_*.
        tm, d = y.shape
        row = lax.broadcasted_iota(jnp.int32, (tm, d), 0) + pl.program_id(0) * block_rows
        col = lax.broadcasted_iota(jnp.int32, (tm, d), 1)
        idx = row * d + col
        bits = _hash_u32((idx ^ seed_ref[0]).astype(jnp.uint32))
        keep = bits >= jnp.uint32(_DROP_THRESH)          # keep with prob 1 - p
        y = jnp.where(keep, y * _KEEP_SCALE, 0.0)

    o_ref[...] = y.astype(o_ref.dtype)


def feed_forward(x, w1, b1, w2, b2, *, training=True, seed=0, block_rows=256):
    """x: (B, T, D) float32.  Returns (B, T, D) float32."""
    B, T, D = x.shape
    H = w1.shape[1]
    N = B * T

    tm = min(block_rows, N)           # token-axis tile; 256 rows sized for v7x VMEM
    grid = (pl.cdiv(N, tm),)

    x2d = x.reshape(N, D)
    w1_bf = w1.astype(jnp.bfloat16)   # pre-cast once: halves weight DMA traffic
    w2_bf = w2.astype(jnp.bfloat16)
    b1_2d = b1.reshape(1, H).astype(jnp.float32)
    b2_2d = b2.reshape(1, D).astype(jnp.float32)
    seed_arr = jnp.array([seed], dtype=jnp.int32)

    kernel = functools.partial(_ffn_kernel, apply_dropout=training, block_rows=tm)

    out2d = pl.pallas_call(
        kernel,
        out_shape=jax.ShapeDtypeStruct((N, D), jnp.float32),
        grid_spec=pltpu.PrefetchScalarGridSpec(
            num_scalar_prefetch=1,
            grid=grid,
            in_specs=[
                pl.BlockSpec((tm, D), lambda i, seed: (i, 0)),   # x: tiled over tokens
                pl.BlockSpec((D, H), lambda i, seed: (0, 0)),    # w1: resident
                pl.BlockSpec((1, H), lambda i, seed: (0, 0)),    # b1: resident
                pl.BlockSpec((H, D), lambda i, seed: (0, 0)),    # w2: resident
                pl.BlockSpec((1, D), lambda i, seed: (0, 0)),    # b2: resident
            ],
            out_specs=pl.BlockSpec((tm, D), lambda i, seed: (i, 0)),
        ),
        compiler_params=pltpu.CompilerParams(
            dimension_semantics=("parallel",)),   # shard token tiles across TCs (v7x)
    )(seed_arr, x2d, w1_bf, b1_2d, w2_bf, b2_2d)

    return out2d.reshape(B, T, D)


def init_params(key, embed_dim):
    """Deterministic synthetic init matching nn.Linear shapes.
    Weights stored as (in, out) so the kernel does x @ W."""
    hidden = 4 * embed_dim
    k1, k2, k3, k4 = jax.random.split(key, 4)
    bound1 = 1.0 / (embed_dim ** 0.5)
    bound2 = 1.0 / (hidden ** 0.5)
    w1 = jax.random.uniform(k1, (embed_dim, hidden), jnp.float32, -bound1, bound1)
    b1 = jax.random.uniform(k2, (hidden,), jnp.float32, -bound1, bound1)
    w2 = jax.random.uniform(k3, (hidden, embed_dim), jnp.float32, -bound2, bound2)
    b2 = jax.random.uniform(k4, (embed_dim,), jnp.float32, -bound2, bound2)
    return w1, b1, w2, b2


if __name__ == "__main__":
    key = jax.random.PRNGKey(0)
    kx, kp = jax.random.split(key)

    B, T, D = 2, 8, EMBED_DIM
    x = jax.random.normal(kx, (B, T, D), jnp.float32)
    w1, b1, w2, b2 = init_params(kp, D)

    # training-mode forward (dropout active)
    out = feed_forward(x, w1, b1, w2, b2, training=True, seed=0)
    out = jax.block_until_ready(out)
    assert out.shape == (B, T, D) and out.dtype == jnp.float32
    zero_frac = float(jnp.mean(out == 0.0))
    assert 0.10 < zero_frac < 0.30, f"dropout zero fraction off: {zero_frac}"

    # eval-mode forward vs pure-JAX reference using the same bf16-operand math
    out_eval = jax.block_until_ready(
        feed_forward(x, w1, b1, w2, b2, training=False))
    xb = x.reshape(-1, D).astype(jnp.bfloat16)
    h_ref = jnp.maximum(
        jnp.dot(xb, w1.astype(jnp.bfloat16),
                preferred_element_type=jnp.float32) + b1, 0.0)
    ref = jnp.dot(h_ref.astype(jnp.bfloat16), w2.astype(jnp.bfloat16),
                  preferred_element_type=jnp.float32) + b2
    assert jnp.allclose(out_eval.reshape(-1, D), ref, atol=1e-2, rtol=1e-2), \
        float(jnp.max(jnp.abs(out_eval.reshape(-1, D) - ref)))

    print("KERNEL_OK")
</pallas_src>

<mosaic_0001>
module attributes {stable_mosaic.version = 11 : i64} {
  func.func @_ffn_kernel(%arg0: i32, %arg1: memref<1xi32, #tpu.memory_space<smem>>, %arg2: memref<16x384xf32, #tpu.memory_space<vmem>>, %arg3: memref<384x1536xbf16, #tpu.memory_space<vmem>>, %arg4: memref<1x1536xf32, #tpu.memory_space<vmem>>, %arg5: memref<1536x384xbf16, #tpu.memory_space<vmem>>, %arg6: memref<1x384xf32, #tpu.memory_space<vmem>>, %arg7: memref<16x384xf32, #tpu.memory_space<vmem>>) attributes {dimension_semantics = [#tpu.dimension_semantics<parallel>], iteration_bounds = array<i64: 1>, scalar_prefetch = 1 : i64, scratch_operands = 0 : i64, tpu.core_type = #tpu.core_type<tc>, window_params = [{transform_indices = @transform_0, window_bounds = array<i64: 16, 384>}, {pipeline_mode = #tpu.pipeline_mode<synchronous>, transform_indices = @transform_1, window_bounds = array<i64: 384, 1536>}, {pipeline_mode = #tpu.pipeline_mode<synchronous>, transform_indices = @transform_2, window_bounds = array<i64: 1, 1536>}, {pipeline_mode = #tpu.pipeline_mode<synchronous>, transform_indices = @transform_3, window_bounds = array<i64: 1536, 384>}, {pipeline_mode = #tpu.pipeline_mode<synchronous>, transform_indices = @transform_4, window_bounds = array<i64: 1, 384>}, {transform_indices = @transform_5, window_bounds = array<i64: 16, 384>}]} {
    %c0 = arith.constant 0 : index
    %c0_0 = arith.constant 0 : index
    %0 = vector.load %arg2[%c0, %c0_0] : memref<16x384xf32, #tpu.memory_space<vmem>>, vector<16x384xf32>
    %1 = arith.truncf %0 : vector<16x384xf32> to vector<16x384xbf16>
    %c0_1 = arith.constant 0 : index
    %c0_2 = arith.constant 0 : index
    %2 = vector.load %arg3[%c0_1, %c0_2] : memref<384x1536xbf16, #tpu.memory_space<vmem>>, vector<384x1536xbf16>
    %cst = arith.constant dense<0.000000e+00> : vector<16x1536xf32>
    %3 = tpu.matmul %1, %2, %cst {dimension_numbers = #tpu.dot_dimension_numbers<[1], [0], [0], [1], [0, 0, 1, 1], [], []>} : vector<16x384xbf16>, vector<384x1536xbf16>, vector<16x1536xf32> -> vector<16x1536xf32>
    %c0_3 = arith.constant 0 : index
    %c0_4 = arith.constant 0 : index
    %4 = vector.load %arg4[%c0_3, %c0_4] : memref<1x1536xf32, #tpu.memory_space<vmem>>, vector<1x1536xf32>
    %5 = vector.broadcast %4 : vector<1x1536xf32> to vector<16x1536xf32>
    %6 = arith.addf %3, %5 : vector<16x1536xf32>
    %cst_5 = arith.constant 0.000000e+00 : f32
    %7 = vector.broadcast %cst_5 : f32 to vector<16x1536xf32>
    %8 = arith.maximumf %6, %7 : vector<16x1536xf32>
    %9 = arith.truncf %8 : vector<16x1536xf32> to vector<16x1536xbf16>
    %c0_6 = arith.constant 0 : index
    %c0_7 = arith.constant 0 : index
    %10 = vector.load %arg5[%c0_6, %c0_7] : memref<1536x384xbf16, #tpu.memory_space<vmem>>, vector<1536x384xbf16>
    %cst_8 = arith.constant dense<0.000000e+00> : vector<16x384xf32>
    %11 = tpu.matmul %9, %10, %cst_8 {dimension_numbers = #tpu.dot_dimension_numbers<[1], [0], [0], [1], [0, 0, 1, 1], [], []>} : vector<16x1536xbf16>, vector<1536x384xbf16>, vector<16x384xf32> -> vector<16x384xf32>
    %c0_9 = arith.constant 0 : index
    %c0_10 = arith.constant 0 : index
    %12 = vector.load %arg6[%c0_9, %c0_10] : memref<1x384xf32, #tpu.memory_space<vmem>>, vector<1x384xf32>
    %13 = vector.broadcast %12 : vector<1x384xf32> to vector<16x384xf32>
    %14 = arith.addf %11, %13 : vector<16x384xf32>
    %15 = tpu.iota {dimensions = array<i32: 0>} : vector<16x384xi32>
    %c16_i32 = arith.constant 16 : i32
    %16 = arith.muli %arg0, %c16_i32 : i32
    %17 = vector.broadcast %16 : i32 to vector<16x384xi32>
    %18 = arith.addi %15, %17 : vector<16x384xi32>
    %19 = tpu.iota {dimensions = array<i32: 1>} : vector<16x384xi32>
    %c384_i32 = arith.constant 384 : i32
    %20 = vector.broadcast %c384_i32 : i32 to vector<16x384xi32>
    %21 = arith.muli %18, %20 : vector<16x384xi32>
    %22 = arith.addi %21, %19 : vector<16x384xi32>
    %c0_11 = arith.constant 0 : index
    %23 = memref.load %arg1[%c0_11] : memref<1xi32, #tpu.memory_space<smem>>
    %24 = vector.broadcast %23 : i32 to vector<16x384xi32>
    %25 = arith.xori %22, %24 : vector<16x384xi32>
    %c-1640531527_i32 = arith.constant -1640531527 : i32
    %26 = vector.broadcast %c-1640531527_i32 : i32 to vector<16x384xi32>
    %27 = arith.muli %25, %26 : vector<16x384xi32>
    %c16_i32_12 = arith.constant 16 : i32
    %28 = vector.broadcast %c16_i32_12 : i32 to vector<16x384xi32>
    %29 = arith.shrui %27, %28 : vector<16x384xi32>
    %30 = arith.xori %27, %29 : vector<16x384xi32>
    %c2146121005_i32 = arith.constant 2146121005 : i32
    %31 = vector.broadcast %c2146121005_i32 : i32 to vector<16x384xi32>
    %32 = arith.muli %30, %31 : vector<16x384xi32>
    %c15_i32 = arith.constant 15 : i32
    %33 = vector.broadcast %c15_i32 : i32 to vector<16x384xi32>
    %34 = arith.shrui %32, %33 : vector<16x384xi32>
    %35 = arith.xori %32, %34 : vector<16x384xi32>
    %c-2073254261_i32 = arith.constant -2073254261 : i32
    %36 = vector.broadcast %c-2073254261_i32 : i32 to vector<16x384xi32>
    %37 = arith.muli %35, %36 : vector<16x384xi32>
    %c16_i32_13 = arith.constant 16 : i32
    %38 = vector.broadcast %c16_i32_13 : i32 to vector<16x384xi32>
    %39 = arith.shrui %37, %38 : vector<16x384xi32>
    %40 = arith.xori %37, %39 : vector<16x384xi32>
    %c858993459_i32 = arith.constant 858993459 : i32
    %41 = vector.broadcast %c858993459_i32 : i32 to vector<16x384xi32>
    %42 = arith.cmpi uge, %40, %41 : vector<16x384xi32>
    %cst_14 = arith.constant 1.250000e+00 : f32
    %43 = vector.broadcast %cst_14 : f32 to vector<16x384xf32>
    %44 = arith.mulf %14, %43 : vector<16x384xf32>
    %cst_15 = arith.constant 0.000000e+00 : f32
    %45 = vector.broadcast %cst_15 : f32 to vector<16x384xf32>
    %46 = arith.select %42, %44, %45 : vector<16x384xi1>, vector<16x384xf32>
    %c0_16 = arith.constant 0 : index
    %c0_17 = arith.constant 0 : index
    %47 = vector.load %arg7[%c0_16, %c0_17] : memref<16x384xf32, #tpu.memory_space<vmem>>, vector<16x384xf32>
    tpu.vector_store %arg7[%c0_16, %c0_17], %46 {strides = array<i32>} : memref<16x384xf32, #tpu.memory_space<vmem>>, vector<16x384xf32>,
    return
  }
  func.func @transform_0(%arg0: i32, %arg1: memref<1xi32, #tpu.memory_space<smem>>) -> (i32, i32) {
    %c0_i32 = arith.constant 0 : i32
    %c0_i32_0 = arith.constant 0 : i32
    return %arg0, %c0_i32 : i32, i32
  }
  func.func @transform_1(%arg0: i32, %arg1: memref<1xi32, #tpu.memory_space<smem>>) -> (i32, i32) {
    %c0_i32 = arith.constant 0 : i32
    %c0_i32_0 = arith.constant 0 : i32
    %c0_i32_1 = arith.constant 0 : i32
    return %c0_i32, %c0_i32_0 : i32, i32
  }
  func.func @transform_2(%arg0: i32, %arg1: memref<1xi32, #tpu.memory_space<smem>>) -> (i32, i32) {
    %c0_i32 = arith.constant 0 : i32
    %c0_i32_0 = arith.constant 0 : i32
    %c0_i32_1 = arith.constant 0 : i32
    return %c0_i32, %c0_i32_0 : i32, i32
  }
  func.func @transform_3(%arg0: i32, %arg1: memref<1xi32, #tpu.memory_space<smem>>) -> (i32, i32) {
    %c0_i32 = arith.constant 0 : i32
    %c0_i32_0 = arith.constant 0 : i32
    %c0_i32_1 = arith.constant 0 : i32
    return %c0_i32, %c0_i32_0 : i32, i32
  }
  func.func @transform_4(%arg0: i32, %arg1: memref<1xi32, #tpu.memory_space<smem>>) -> (i32, i32) {
    %c0_i32 = arith.constant 0 : i32
    %c0_i32_0 = arith.constant 0 : i32
    %c0_i32_1 = arith.constant 0 : i32
    return %c0_i32, %c0_i32_0 : i32, i32
  }
  func.func @transform_5(%arg0: i32, %arg1: memref<1xi32, #tpu.memory_space<smem>>) -> (i32, i32) {
    %c0_i32 = arith.constant 0 : i32
    %c0_i32_0 = arith.constant 0 : i32
    return %arg0, %c0_i32 : i32, i32
  }
}

</mosaic_0001>

<bundles_post_ra>
// kernel: tpu_custom_call.1
= control target key start
LH: loop header
LB: loop body
LE: loop exit
PB: predicated region body
PF: predicated region fallthrough
CT: control target
= control target key end

     0   :  { %12 = vsyncpa [#allocation5], 0  ;;  %s7003_s0 = inlined_call_operand.<no memory space> [shape: s32[1], index: 0, kind: input, shape index: {}]   ;;  %s7004_s1 = inlined_call_operand.hbm [shape: f32[16,384], index: 1, kind: input, shape index: {}]   ;;  %s7005_s2 = inlined_call_operand.hbm [shape: bf16[384,1536], index: 2, kind: input, shape index: {}]   ;;  %s7006_s3 = inlined_call_operand.hbm [shape: f32[1,1536], index: 3, kind: input, shape index: {}]   ;;  %s7007_s4 = inlined_call_operand.hbm [shape: bf16[1536,384], index: 4, kind: input, shape index: {}]   ;;  %s7008_s5 = inlined_call_operand.hbm [shape: f32[1,384], index: 5, kind: input, shape index: {}]   ;;  %s7009_s6 = inlined_call_operand.hbm [shape: f32[16,384], index: 6, kind: output, shape index: {}]  }
   0x1   :  { %13 = vsyncpa [#allocation8], 0 }
   0x2   :  { %14 = vsyncpa [#allocation11], 0 }
   0x3   :  { %15 = vsyncpa [#allocation6], 0  ;;  %s6756_s21 = smov [#allocation7]   ;;  %s6616_s25 = scalar_lea.hbm %s7005_s2, 36864 }
   0x4   :  { %s33_s22 = sshll.u32 %s6756_s21, 4  ;;  %p6617_p0 = scmp.ne.s32.totalorder %s7005_s2, %s6616_s25  ;;  %s34_s22 = int_to_ptr.vmem [resolvable:$true] %s33_s22 }
   0x5   :  { %p6620_p1 = scmp.lt.u32.totalorder %s6616_s25, %s7005_s2 }
   0x7   :  { %p6622_p2 = pnand %p6620_p1, %p6617_p0 }
   0x9   :  { %6625 = shalt.err (!%p6622_p2)
}
   0xa   :  { %s6626_s30 = scalar_lea.vmem %s34_s22, 36864  ;;  %p6631_p4 = scmp.lt.s32.totalorder %s34_s22, %s34_s22 }
   0xb   :  { %p6627_p3 = scmp.ne.s32.totalorder %s34_s22, %s6626_s30  ;;  %p6632_p5 = scmp.lt.s32.totalorder %s6626_s30, %s6626_s30 }
   0xd   :  { %p6633_p6 = por %p6632_p5, %p6631_p4 }
   0xf   :  { %p6634_p7 = pnand %p6633_p6, %p6627_p3 }
  0x11   :  { %6637 = shalt.err (!%p6634_p7)
}
  0x12   :  { %s6757_s7 = smov 768   ;;  %s6758_s8 = smov 48  }
  0x13   :  { %39 = dma.hbm_to_vmem [thread:$0]  %s7005_s2, 36864, %s34_s22, [#allocation8], %s6757_s7, %s6757_s7, %s6758_s8  }
  0x14   :  { %s6759_s11 = smov [#allocation10]   ;;  %s6638_s15 = scalar_lea.hbm %s7007_s4, 36864 }
  0x15   :  { %s55_s12 = sshll.u32 %s6759_s11, 4  ;;  %p6639_p8 = scmp.ne.s32.totalorder %s7007_s4, %s6638_s15  ;;  %s56_s12 = int_to_ptr.vmem [resolvable:$true] %s55_s12 }
  0x16   :  { %p6642_p9 = scmp.lt.u32.totalorder %s6638_s15, %s7007_s4 }
  0x18   :  { %p6644_p10 = pnand %p6642_p9, %p6639_p8 }
  0x1a   :  { %6647 = shalt.err (!%p6644_p10)
}
  0x1b   :  { %s6648_s20 = scalar_lea.vmem %s56_s12, 36864  ;;  %p6653_p12 = scmp.lt.s32.totalorder %s56_s12, %s56_s12 }
  0x1c   :  { %p6649_p11 = scmp.ne.s32.totalorder %s56_s12, %s6648_s20  ;;  %p6654_p13 = scmp.lt.s32.totalorder %s6648_s20, %s6648_s20 }
  0x1e   :  { %p6655_p0 = por %p6654_p13, %p6653_p12 }
  0x20   :  { %p6656_p1 = pnand %p6655_p0, %p6649_p11 }
  0x22   :  { %6659 = shalt.err (!%p6656_p1)
}
  0x23   :  { %s6760_s2 = smov 192   ;;  %s6761_s21 = smov 12  }
  0x24   :  { %61 = dma.hbm_to_vmem [thread:$0]  %s7007_s4, 36864, %s56_s12, [#allocation11], %s6760_s2, %s6760_s2, %s6761_s21  }
  0x25   :  { %s6762_s24 = smov [#allocation4]   ;;  %s6660_s28 = scalar_lea.hbm %s7004_s1, 768 }
  0x26   :  { %s21_s25 = sshll.u32 %s6762_s24, 4  ;;  %p6661_p2 = scmp.ne.s32.totalorder %s7004_s1, %s6660_s28  ;;  %s22_s25 = int_to_ptr.vmem [resolvable:$true] %s21_s25 }
  0x27   :  { %p6664_p3 = scmp.lt.u32.totalorder %s6660_s28, %s7004_s1 }
  0x29   :  { %p6666_p4 = pnand %p6664_p3, %p6661_p2 }
  0x2b   :  { %6669 = shalt.err (!%p6666_p4)
}
  0x2c   :  { %s6670_s9 = scalar_lea.vmem %s22_s25, 768  ;;  %p6675_p6 = scmp.lt.s32.totalorder %s22_s25, %s22_s25 }
  0x2d   :  { %p6671_p5 = scmp.ne.s32.totalorder %s22_s25, %s6670_s9  ;;  %p6676_p7 = scmp.lt.s32.totalorder %s6670_s9, %s6670_s9 }
  0x2f   :  { %p6677_p8 = por %p6676_p7, %p6675_p6 }
  0x31   :  { %p6678_p9 = pnand %p6677_p8, %p6671_p5 }
  0x33   :  { %6681 = shalt.err (!%p6678_p9)
}
  0x34   :  { %s6763_s4 = smov 384   ;;  %s6764_s10 = smov 24  }
  0x35   :  { %27 = dma.hbm_to_vmem [thread:$0]  %s7004_s1, 768, %s22_s25, [#allocation5], %s6763_s4, %s6763_s4, %s6764_s10  }
  0x36   :  { %s6765_s13 = smov [#allocation9]   ;;  %s6766_s15 = smov [#allocation12]  }
  0x37   :  { %s46_s14 = sshll.u32 %s6765_s13, 4  ;;  %s68_s16 = sshll.u32 %s6766_s15, 4  ;;  %s47_s14 = int_to_ptr.vmem [resolvable:$true] %s46_s14  ;;  %s69_s16 = int_to_ptr.vmem [resolvable:$true] %s68_s16 }
  0x38   :  { %s6682_s19 = scalar_lea.hbm %s7006_s3, 192 }
  0x39   :  { %p6683_p10 = scmp.ne.s32.totalorder %s7006_s3, %s6682_s19  ;;  %p6686_p11 = scmp.lt.u32.totalorder %s6682_s19, %s7006_s3 }
  0x3b   :  { %p6688_p12 = pnand %p6686_p11, %p6683_p10 }
  0x3d   :  { %6691 = shalt.err (!%p6688_p12)
}
  0x3e   :  { %s6692_s1 = scalar_lea.vmem %s47_s14, 192  ;;  %p6697_p0 = scmp.lt.s32.totalorder %s47_s14, %s47_s14 }
  0x3f   :  { %p6693_p13 = scmp.ne.s32.totalorder %s47_s14, %s6692_s1  ;;  %p6698_p1 = scmp.lt.s32.totalorder %s6692_s1, %s6692_s1 }
  0x41   :  { %p6699_p2 = por %p6698_p1, %p6697_p0 }
  0x43   :  { %p6700_p3 = pnand %p6699_p2, %p6693_p13 }
  0x45   :  { %6703 = shalt.err (!%p6700_p3)
}
  0x46   :  { %49 = dma.hbm_to_vmem [thread:$0]  %s7006_s3, 192, %s47_s14, [#allocation8]  }
  0x47   :  { %s6704_s27 = scalar_lea.hbm %s7008_s5, 48 }
  0x48   :  { %p6705_p4 = scmp.ne.s32.totalorder %s7008_s5, %s6704_s27  ;;  %p6708_p5 = scmp.lt.u32.totalorder %s6704_s27, %s7008_s5 }
  0x4a   :  { %p6710_p6 = pnand %p6708_p5, %p6705_p4 }
  0x4c   :  { %6713 = shalt.err (!%p6710_p6)
}
  0x4d   :  { %s6714_s8 = scalar_lea.vmem %s69_s16, 48  ;;  %s6718_s9 = scalar_lea.vmem %s69_s16, 64 }
  0x4e   :  { %p6715_p7 = scmp.ne.s32.totalorder %s69_s16, %s6714_s8  ;;  %p6719_p8 = scmp.lt.s32.totalorder %s69_s16, %s69_s16 }
  0x4f   :  { %p6720_p9 = scmp.lt.s32.totalorder %s6718_s9, %s6714_s8 }
  0x51   :  { %p6721_p10 = por %p6720_p9, %p6719_p8 }
  0x53   :  { %p6722_p11 = pnand %p6721_p10, %p6715_p7 }
  0x55   :  { %6725 = shalt.err (!%p6722_p11)
}
  0x56   :  { %71 = dma.hbm_to_vmem [thread:$0]  %s7008_s5, 48, %s69_s16, [#allocation11]  }
  0x57   :  { %6748 = dma.done.wait [#allocation5], 768  }
  0x58   :  { %6749 = vsyncadd [#allocation5], 4294966528 }
  0x59   :  { %6750 = dma.done.wait [#allocation8], 37056  }
  0x5a   :  { %6751 = vsyncadd [#allocation8], 4294930240 }
  0x5b   :  { %6752 = dma.done.wait [#allocation11], 36912  }
  0x5c   :  { %6753 = vsyncadd [#allocation11], 4294930384  ;;  %v5799_v0 = vld [vmem:[#allocation7 + $0x4] ss:$48 sps:$4 sm:$0xff]   ;;  %v5801_v1 = vld [vmem:[#allocation7] ss:$48 sps:$4 sm:$0xff]  }
  0x5d   :  { %1889 = vmatprep.subr.bf16.mxu1 %v5799_v0  ;;  %v5802_v2 = vld [vmem:[#allocation7 + $0x64] ss:$48 sps:$4 sm:$0xff]   ;;  %v5804_v3 = vld [vmem:[#allocation7 + $0x60] ss:$48 sps:$4 sm:$0xff]   ;;  %v89_v18 = vld [vmem:[#allocation4 + $0x8] sm:$0xff] }
  0x5e   :  { %1890 = vmatpush1.bf16.msra.mxu1 %v5801_v1  ;;  %v5805_v4 = vld [vmem:[#allocation7 + $0xc4] ss:$48 sps:$4 sm:$0xff]   ;;  %v5807_v5 = vld [vmem:[#allocation7 + $0xc0] ss:$48 sps:$4 sm:$0xff]   ;;  %v91_v58 = vld [vmem:[#allocation4 + $0x18] sm:$0xff] }
  0x5f   :  { %1891 = vmatprep.subr.bf16.mxu1 %v5802_v2  ;;  %v5808_v6 = vld [vmem:[#allocation7 + $0x124] ss:$48 sps:$4 sm:$0xff]   ;;  %v5810_v7 = vld [vmem:[#allocation7 + $0x120] ss:$48 sps:$4 sm:$0xff]  }
  0x60   :  { %v5811_v8 = vld [vmem:[#allocation7 + $0x184] ss:$48 sps:$4 sm:$0xff]   ;;  %v5813_v9 = vld [vmem:[#allocation7 + $0x180] ss:$48 sps:$4 sm:$0xff]  }
  0x61   :  { %v5814_v10 = vld [vmem:[#allocation7 + $0x1e4] ss:$48 sps:$4 sm:$0xff]   ;;  %v5816_v11 = vld [vmem:[#allocation7 + $0x1e0] ss:$48 sps:$4 sm:$0xff]  }
  0x62   :  { %1892 = vmatpush1.bf16.msra.mxu1 %v5804_v3  ;;  %v5817_v12 = vld [vmem:[#allocation7 + $0x244] ss:$48 sps:$4 sm:$0xff]   ;;  %v5819_v14 = vld [vmem:[#allocation7 + $0x240] ss:$48 sps:$4 sm:$0xff]   ;;  %v6767_v3 = vmov 0  }
  0x63   :  { %1893 = vmatprep.subr.bf16.mxu1 %v5805_v4  ;;  %v5844_v13 = vld [vmem:[#allocation7 + $0x14] ss:$48 sps:$4 sm:$0xff]   ;;  %v5848_v16 = vld [vmem:[#allocation7 + $0x10] ss:$48 sps:$4 sm:$0xff]  }
  0x64   :  { %v5820_v15 = vld [vmem:[#allocation7 + $0x2a4] ss:$48 sps:$4 sm:$0xff]   ;;  %2061 = vmatprep.subr.bf16.mxu0 %v5844_v13  ;;  %v5855_v21 = vld [vmem:[#allocation7 + $0x70] ss:$48 sps:$4 sm:$0xff]  }
  0x65   :  { %v5850_v17 = vld [vmem:[#allocation7 + $0x74] ss:$48 sps:$4 sm:$0xff]   ;;  %2062 = vmatpush1.bf16.msra.mxu0 %v5848_v16  ;;  %v5822_v22 = vld [vmem:[#allocation7 + $0x2a0] ss:$48 sps:$4 sm:$0xff]  }
  0x66   :  { %1894 = vmatpush1.bf16.msra.mxu1 %v5807_v5  ;;  %v92_v19 = vld [vmem:[#allocation4 + $0x20] sm:$0xff]  ;;  %2063 = vmatprep.subr.bf16.mxu0 %v5850_v17 }
  0x67   :  { %1895 = vmatprep.subr.bf16.mxu1 %v5808_v6  ;;  %v6867_v20 = vpack.c.bf16 %v92_v19, %v89_v18  ;;  %v5856_v23 = vld [vmem:[#allocation7 + $0xd4] ss:$48 sps:$4 sm:$0xff]   ;;  %v5861_v25 = vld [vmem:[#allocation7 + $0xd0] ss:$48 sps:$4 sm:$0xff]  }
  0x68   :  { %v5823_v24 = vld [vmem:[#allocation7 + $0x304] ss:$48 sps:$4 sm:$0xff]   ;;  %v5825_v27 = vld [vmem:[#allocation7 + $0x300] ss:$48 sps:$4 sm:$0xff]  }
  0x69   :  { %1921 = vmatprep.mubr.bf16.mxu1 %v6867_v20  ;;  %2064 = vmatpush1.bf16.msra.mxu0 %v5855_v21  ;;  %v5862_v26 = vld [vmem:[#allocation7 + $0x134] ss:$48 sps:$4 sm:$0xff]   ;;  %v5867_v29 = vld [vmem:[#allocation7 + $0x130] ss:$48 sps:$4 sm:$0xff]  }
  0x6a   :  { %1896 = vmatpush1.bf16.msra.mxu1 %v5810_v7  ;;  %2065 = vmatprep.subr.bf16.mxu0 %v5856_v23  ;;  %v5826_v28 = vld [vmem:[#allocation7 + $0x364] ss:$48 sps:$4 sm:$0xff]   ;;  %v5828_v31 = vld [vmem:[#allocation7 + $0x360] ss:$48 sps:$4 sm:$0xff]  }
  0x6b   :  { %1897 = vmatprep.subr.bf16.mxu1 %v5811_v8  ;;  %2093 = vmatprep.mubr.bf16.mxu0 %v6867_v20  ;;  %v5868_v30 = vld [vmem:[#allocation7 + $0x194] ss:$48 sps:$4 sm:$0xff]   ;;  %v5873_v33 = vld [vmem:[#allocation7 + $0x190] ss:$48 sps:$4 sm:$0xff]  }
  0x6c   :  { %v5829_v32 = vld [vmem:[#allocation7 + $0x3c4] ss:$48 sps:$4 sm:$0xff]   ;;  %v5831_v35 = vld [vmem:[#allocation7 + $0x3c0] ss:$48 sps:$4 sm:$0xff]  }
  0x6d   :  { %2066 = vmatpush1.bf16.msra.mxu0 %v5861_v25  ;;  %v5874_v34 = vld [vmem:[#allocation7 + $0x1f4] ss:$48 sps:$4 sm:$0xff]   ;;  %v5879_v37 = vld [vmem:[#allocation7 + $0x1f0] ss:$48 sps:$4 sm:$0xff]  }
  0x6e   :  { %1898 = vmatpush1.bf16.msra.mxu1 %v5813_v9  ;;  %2067 = vmatprep.subr.bf16.mxu0 %v5862_v26  ;;  %v5832_v36 = vld [vmem:[#allocation7 + $0x424] ss:$48 sps:$4 sm:$0xff]   ;;  %v5834_v39 = vld [vmem:[#allocation7 + $0x420] ss:$48 sps:$4 sm:$0xff]  }
  0x6f   :  { %1899 = vmatprep.subr.bf16.mxu1 %v5814_v10  ;;  %v5880_v38 = vld [vmem:[#allocation7 + $0x254] ss:$48 sps:$4 sm:$0xff]   ;;  %v5885_v41 = vld [vmem:[#allocation7 + $0x250] ss:$48 sps:$4 sm:$0xff]  }
  0x70   :  { %v5835_v40 = vld [vmem:[#allocation7 + $0x484] ss:$48 sps:$4 sm:$0xff]   ;;  %v5837_v43 = vld [vmem:[#allocation7 + $0x480] ss:$48 sps:$4 sm:$0xff]  }
  0x71   :  { %2068 = vmatpush1.bf16.msra.mxu0 %v5867_v29  ;;  %v5886_v42 = vld [vmem:[#allocation7 + $0x2b4] ss:$48 sps:$4 sm:$0xff]   ;;  %v5891_v45 = vld [vmem:[#allocation7 + $0x2b0] ss:$48 sps:$4 sm:$0xff]  }
  0x72   :  { %1900 = vmatpush1.bf16.msra.mxu1 %v5816_v11  ;;  %2069 = vmatprep.subr.bf16.mxu0 %v5868_v30  ;;  %v5838_v44 = vld [vmem:[#allocation7 + $0x4e4] ss:$48 sps:$4 sm:$0xff]   ;;  %v5840_v47 = vld [vmem:[#allocation7 + $0x4e0] ss:$48 sps:$4 sm:$0xff]   ;;  %v93_v30 = vld [vmem:[#allocation4 + $0x28] sm:$0xff] }
  0x73   :  { %1901 = vmatprep.subr.bf16.mxu1 %v5817_v12  ;;  %v5892_v46 = vld [vmem:[#allocation7 + $0x314] ss:$48 sps:$4 sm:$0xff]   ;;  %v5897_v49 = vld [vmem:[#allocation7 + $0x310] ss:$48 sps:$4 sm:$0xff]  }
  0x74   :  { %v5841_v48 = vld [vmem:[#allocation7 + $0x544] ss:$48 sps:$4 sm:$0xff]   ;;  %v5843_v51 = vld [vmem:[#allocation7 + $0x540] ss:$48 sps:$4 sm:$0xff]  }
  0x75   :  { %2070 = vmatpush1.bf16.msra.mxu0 %v5873_v33  ;;  %v5898_v50 = vld [vmem:[#allocation7 + $0x374] ss:$48 sps:$4 sm:$0xff]   ;;  %v5903_v53 = vld [vmem:[#allocation7 + $0x370] ss:$48 sps:$4 sm:$0xff]  }
  0x76   :  { %1902 = vmatpush1.bf16.msra.mxu1 %v5819_v14  ;;  %2071 = vmatprep.subr.bf16.mxu0 %v5874_v34  ;;  %v5846_v52 = vld [vmem:[#allocation7 + $0x5a4] ss:$48 sps:$4 sm:$0xff]   ;;  %v5849_v54 = vld [vmem:[#allocation7 + $0x5a0] ss:$48 sps:$4 sm:$0xff]  }
  0x77   :  { %1903 = vmatprep.subr.bf16.mxu1 %v5820_v15  ;;  %v5904_v55 = vld [vmem:[#allocation7 + $0x3d4] ss:$48 sps:$4 sm:$0xff]   ;;  %v5909_v59 = vld [vmem:[#allocation7 + $0x3d0] ss:$48 sps:$4 sm:$0xff]  }
  0x78   :  { %v5854_v56 = vld [vmem:[#allocation7 + $0x604] ss:$48 sps:$4 sm:$0xff]   ;;  %v5852_v62 = vld [vmem:[#allocation7 + $0x600] ss:$48 sps:$4 sm:$0xff]  }
  0x79   :  { %2072 = vmatpush1.bf16.msra.mxu0 %v5879_v37  ;;  %v88_v57 = vld [vmem:[#allocation4] sm:$0xff]  ;;  %v90_v29 = vld [vmem:[#allocation4 + $0x10] sm:$0xff] }
  0x7a   :  { %1904 = vmatpush1.bf16.msra.mxu1 %v5822_v22  ;;  %2073 = vmatprep.subr.bf16.mxu0 %v5880_v38  ;;  %v5910_v60 = vld [vmem:[#allocation7 + $0x434] ss:$48 sps:$4 sm:$0xff]   ;;  %v6871_v61 = vpack.c.bf16 %v91_v58, %v88_v57  ;;  %v5915_v0 = vld [vmem:[#allocation7 + $0x430] ss:$48 sps:$4 sm:$0xff]   ;;  %v6877_v34 = vpack.c.bf16 %v93_v30, %v90_v29  ;;  %v5985_v30 = vld [vmem:[#allocation7 + $0x548] ss:$48 sps:$4 sm:$0xff]  }
  0x7b   :  { %1905 = vmatprep.subr.bf16.mxu1 %v5823_v24  ;;  %v5860_v63 = vld [vmem:[#allocation7 + $0x664] ss:$48 sps:$4 sm:$0xff]   ;;  %v5858_v2 = vld [vmem:[#allocation7 + $0x660] ss:$48 sps:$4 sm:$0xff]  }
  0x7c   :  { %v5916_v1 = vld [vmem:[#allocation7 + $0x494] ss:$48 sps:$4 sm:$0xff]   ;;  %v5921_v5 = vld [vmem:[#allocation7 + $0x490] ss:$48 sps:$4 sm:$0xff]  }
  0x7d   :  { %2074 = vmatpush1.bf16.msra.mxu0 %v5885_v41  ;;  %v5866_v4 = vld [vmem:[#allocation7 + $0x6c4] ss:$48 sps:$4 sm:$0xff]   ;;  %v5864_v7 = vld [vmem:[#allocation7 + $0x6c0] ss:$48 sps:$4 sm:$0xff]  }
  0x7e   :  { %1906 = vmatpush1.bf16.msra.mxu1 %v5825_v27  ;;  %2075 = vmatprep.subr.bf16.mxu0 %v5886_v42  ;;  %v5922_v6 = vld [vmem:[#allocation7 + $0x4f4] ss:$48 sps:$4 sm:$0xff]   ;;  %v5927_v9 = vld [vmem:[#allocation7 + $0x4f0] ss:$48 sps:$4 sm:$0xff]  }
  0x7f   :  { %1907 = vmatprep.subr.bf16.mxu1 %v5826_v28  ;;  %v5872_v8 = vld [vmem:[#allocation7 + $0x724] ss:$48 sps:$4 sm:$0xff]   ;;  %v5870_v11 = vld [vmem:[#allocation7 + $0x720] ss:$48 sps:$4 sm:$0xff]  }
  0x80   :  { %v5928_v10 = vld [vmem:[#allocation7 + $0x554] ss:$48 sps:$4 sm:$0xff]   ;;  %v5933_v13 = vld [vmem:[#allocation7 + $0x550] ss:$48 sps:$4 sm:$0xff]  }
  0x81   :  { %2076 = vmatpush1.bf16.msra.mxu0 %v5891_v45  ;;  %v5878_v12 = vld [vmem:[#allocation7 + $0x784] ss:$48 sps:$4 sm:$0xff]   ;;  %v5876_v15 = vld [vmem:[#allocation7 + $0x780] ss:$48 sps:$4 sm:$0xff]  }
  0x82   :  { %1908 = vmatpush1.bf16.msra.mxu1 %v5828_v31  ;;  %2077 = vmatprep.subr.bf16.mxu0 %v5892_v46  ;;  %v5934_v14 = vld [vmem:[#allocation7 + $0x5b4] ss:$48 sps:$4 sm:$0xff]   ;;  %v5939_v17 = vld [vmem:[#allocation7 + $0x5b0] ss:$48 sps:$4 sm:$0xff]   ;;  %v5902_v31 = vld [vmem:[#allocation7 + $0xc] ss:$48 sps:$4 sm:$0xff]  }
  0x83   :  { %1909 = vmatprep.subr.bf16.mxu1 %v5829_v32  ;;  %v5884_v16 = vld [vmem:[#allocation7 + $0x7e4] ss:$48 sps:$4 sm:$0xff]   ;;  %v5882_v19 = vld [vmem:[#allocation7 + $0x7e0] ss:$48 sps:$4 sm:$0xff]  }
  0x84   :  { %v5942_v18 = vld [vmem:[#allocation7 + $0x614] ss:$48 sps:$4 sm:$0xff]   ;;  %v5940_v22 = vld [vmem:[#allocation7 + $0x610] ss:$48 sps:$4 sm:$0xff]  }
  0x85   :  { %2078 = vmatpush1.bf16.msra.mxu0 %v5897_v49  ;;  %v5890_v21 = vld [vmem:[#allocation7 + $0x844] ss:$48 sps:$4 sm:$0xff]   ;;  %v5888_v24 = vld [vmem:[#allocation7 + $0x840] ss:$48 sps:$4 sm:$0xff]  }
  0x86   :  { %1910 = vmatpush1.bf16.msra.mxu1 %v5831_v35  ;;  %2079 = vmatprep.subr.bf16.mxu0 %v5898_v50  ;;  %v5948_v23 = vld [vmem:[#allocation7 + $0x674] ss:$48 sps:$4 sm:$0xff]   ;;  %v5946_v26 = vld [vmem:[#allocation7 + $0x670] ss:$48 sps:$4 sm:$0xff]   ;;  %v5900_v35 = vld [vmem:[#allocation7 + $0x8] ss:$48 sps:$4 sm:$0xff]  }
  0x87   :  { %1911 = vmatprep.subr.bf16.mxu1 %v5832_v36  ;;  %v5896_v25 = vld [vmem:[#allocation7 + $0x8a4] ss:$48 sps:$4 sm:$0xff]   ;;  %v5894_v27 = vld [vmem:[#allocation7 + $0x8a0] ss:$48 sps:$4 sm:$0xff]   ;;  %v5908_v36 = vld [vmem:[#allocation7 + $0x6c] ss:$48 sps:$4 sm:$0xff]  }
  0x88   :  { %v5954_v28 = vld [vmem:[#allocation7 + $0x6d4] ss:$48 sps:$4 sm:$0xff]   ;;  %v5952_v32 = vld [vmem:[#allocation7 + $0x6d0] ss:$48 sps:$4 sm:$0xff]  }
  0x89   :  { %2080 = vmatpush1.bf16.msra.mxu0 %v5903_v53  ;;  %v5960_v33 = vld [vmem:[#allocation7 + $0x734] ss:$48 sps:$4 sm:$0xff]   ;;  %v5958_v37 = vld [vmem:[#allocation7 + $0x730] ss:$48 sps:$4 sm:$0xff]  }
  0x8a   :  { %1912 = vmatpush1.bf16.msra.mxu1 %v5834_v39  ;;  %2081 = vmatprep.subr.bf16.mxu0 %v5904_v55  ;;  %v5966_v38 = vld [vmem:[#allocation7 + $0x794] ss:$48 sps:$4 sm:$0xff]   ;;  %v5906_v39 = vld [vmem:[#allocation7 + $0x68] ss:$48 sps:$4 sm:$0xff]   ;;  %v5964_v41 = vld [vmem:[#allocation7 + $0x790] ss:$48 sps:$4 sm:$0xff]  }
  0x8b   :  { %1913 = vmatprep.subr.bf16.mxu1 %v5835_v40  ;;  %v5914_v40 = vld [vmem:[#allocation7 + $0xcc] ss:$48 sps:$4 sm:$0xff]   ;;  %v5972_v42 = vld [vmem:[#allocation7 + $0x7f4] ss:$48 sps:$4 sm:$0xff]   ;;  %v5970_v45 = vld [vmem:[#allocation7 + $0x7f0] ss:$48 sps:$4 sm:$0xff]  }
  0x8c   :  { %v5978_v46 = vld [vmem:[#allocation7 + $0x854] ss:$48 sps:$4 sm:$0xff]   ;;  %v5976_v49 = vld [vmem:[#allocation7 + $0x850] ss:$48 sps:$4 sm:$0xff]   ;;  %v5930_v55 = vld [vmem:[#allocation7 + $0x1e8] ss:$48 sps:$4 sm:$0xff]  }
  0x8d   :  { %2082 = vmatpush1.bf16.msra.mxu0 %v5909_v59  ;;  %v5984_v50 = vld [vmem:[#allocation7 + $0x8b4] ss:$48 sps:$4 sm:$0xff]   ;;  %v5982_v53 = vld [vmem:[#allocation7 + $0x8b0] ss:$48 sps:$4 sm:$0xff]   ;;  %v5936_v59 = vld [vmem:[#allocation7 + $0x248] ss:$48 sps:$4 sm:$0xff]  }
  0x8e   :  { %1914 = vmatpush1.bf16.msra.mxu1 %v5837_v43  ;;  %2083 = vmatprep.subr.bf16.mxu0 %v5910_v60  ;;  %v5912_v43 = vld [vmem:[#allocation7 + $0xc8] ss:$48 sps:$4 sm:$0xff]   ;;  %v5988_v57 = vld [vmem:[#allocation7 + $0x20] ss:$48 sps:$4 sm:$0xff]   ;;  %v5996_v58 = vld [vmem:[#allocation7 + $0x84] ss:$48 sps:$4 sm:$0xff]  }
  0x8f   :  { %1915 = vmatprep.subr.bf16.mxu1 %v5838_v44  ;;  %v5920_v44 = vld [vmem:[#allocation7 + $0x12c] ss:$48 sps:$4 sm:$0xff]   ;;  %v6044_v29 = vld [vmem:[#allocation7 + $0x384] ss:$48 sps:$4 sm:$0xff]  }
  0x90   :  { %v5945_v60 = vld [vmem:[#allocation7 + $0x2ac] ss:$48 sps:$4 sm:$0xff]  }
  0x91   :  { %2084 = vmatpush1.bf16.msra.mxu0 %v5915_v0  ;;  %v5943_v0 = vld [vmem:[#allocation7 + $0x2a8] ss:$48 sps:$4 sm:$0xff]  }
  0x92   :  { %1916 = vmatpush1.bf16.msra.mxu1 %v5840_v47  ;;  %2085 = vmatprep.subr.bf16.mxu0 %v5916_v1  ;;  %v5918_v47 = vld [vmem:[#allocation7 + $0x128] ss:$48 sps:$4 sm:$0xff]   ;;  %v5951_v1 = vld [vmem:[#allocation7 + $0x30c] ss:$48 sps:$4 sm:$0xff]  }
  0x93   :  { %1917 = vmatprep.subr.bf16.mxu1 %v5841_v48  ;;  %v5926_v48 = vld [vmem:[#allocation7 + $0x18c] ss:$48 sps:$4 sm:$0xff]  }
  0x95   :  { %2086 = vmatpush1.bf16.msra.mxu0 %v5921_v5  ;;  %v5949_v5 = vld [vmem:[#allocation7 + $0x308] ss:$48 sps:$4 sm:$0xff]  }
  0x96   :  { %1918 = vmatpush1.bf16.msra.mxu1 %v5843_v51  ;;  %2087 = vmatprep.subr.bf16.mxu0 %v5922_v6  ;;  %v5924_v51 = vld [vmem:[#allocation7 + $0x188] ss:$48 sps:$4 sm:$0xff]   ;;  %v5957_v6 = vld [vmem:[#allocation7 + $0x36c] ss:$48 sps:$4 sm:$0xff]  }
  0x97   :  { %1919 = vmatprep.subr.bf16.mxu1 %v5846_v52  ;;  %v5932_v52 = vld [vmem:[#allocation7 + $0x1ec] ss:$48 sps:$4 sm:$0xff]  }
  0x99   :  { %2088 = vmatpush1.bf16.msra.mxu0 %v5927_v9  ;;  %v5955_v9 = vld [vmem:[#allocation7 + $0x368] ss:$48 sps:$4 sm:$0xff]  }
  0x9a   :  { %1920 = vmatpush1.bf16.msra.mxu1 %v5849_v54  ;;  %2089 = vmatprep.subr.bf16.mxu0 %v5928_v10  ;;  %v5990_v54 = vld [vmem:[#allocation7 + $0x24] ss:$48 sps:$4 sm:$0xff]   ;;  %v5963_v10 = vld [vmem:[#allocation7 + $0x3cc] ss:$48 sps:$4 sm:$0xff]  }
  0x9b   :  { %1932 = vmatprep.subr.bf16.mxu1 %v5854_v56  ;;  %v5938_v56 = vld [vmem:[#allocation7 + $0x24c] ss:$48 sps:$4 sm:$0xff]  }
  0x9d   :  { %1922 = vmatmul.mubr.bf16.vlgmr.msra.gmra.mrb[0].mxu1 %v6871_v61  ;;  %2090 = vmatpush1.bf16.msra.mxu0 %v5933_v13  ;;  %v5961_v13 = vld [vmem:[#allocation7 + $0x3c8] ss:$48 sps:$4 sm:$0xff]  }
  0x9e   :  { %1933 = vmatpush1.bf16.msra.mxu1 %v5852_v62  ;;  %1964 = vmatprep.mubr.bf16.mxu1 %v6767_v3  ;;  %v5994_v62 = vld [vmem:[#allocation7 + $0x80] ss:$48 sps:$4 sm:$0xff]  }
  0x9f   :  { %1934 = vmatprep.subr.bf16.mxu1 %v5860_v63  ;;  %2091 = vmatprep.subr.bf16.mxu0 %v5934_v14  ;;  %v6002_v63 = vld [vmem:[#allocation7 + $0xe4] ss:$48 sps:$4 sm:$0xff]   ;;  %v5969_v14 = vld [vmem:[#allocation7 + $0x42c] ss:$48 sps:$4 sm:$0xff]  }
  0xa1   :  { %2092 = vmatpush1.bf16.msra.mxu0 %v5939_v17  ;;  %v5967_v17 = vld [vmem:[#allocation7 + $0x428] ss:$48 sps:$4 sm:$0xff]  }
  0xa2   :  { %1935 = vmatpush1.bf16.msra.mxu1 %v5858_v2  ;;  %2104 = vmatprep.subr.bf16.mxu0 %v5942_v18  ;;  %v6000_v2 = vld [vmem:[#allocation7 + $0xe0] ss:$48 sps:$4 sm:$0xff]   ;;  %v5975_v18 = vld [vmem:[#allocation7 + $0x48c] ss:$48 sps:$4 sm:$0xff]  }
  0xa3   :  { %1936 = vmatprep.subr.bf16.mxu1 %v5866_v4  ;;  %v6008_v4 = vld [vmem:[#allocation7 + $0x144] ss:$48 sps:$4 sm:$0xff]  }
  0xa4   :  { %2094 = vmatmul.mubr.bf16.vlgmr.msra.gmra.mrb[0].mxu0 %v6871_v61 }
  0xa5   :  { %2105 = vmatpush1.bf16.msra.mxu0 %v5940_v22  ;;  %2136 = vmatprep.mubr.bf16.mxu0 %v6767_v3  ;;  %v5973_v22 = vld [vmem:[#allocation7 + $0x488] ss:$48 sps:$4 sm:$0xff]  }
  0xa6   :  { %1937 = vmatpush1.bf16.msra.mxu1 %v5864_v7  ;;  %2106 = vmatprep.subr.bf16.mxu0 %v5948_v23  ;;  %v6006_v7 = vld [vmem:[#allocation7 + $0x140] ss:$48 sps:$4 sm:$0xff]   ;;  %v5981_v23 = vld [vmem:[#allocation7 + $0x4ec] ss:$48 sps:$4 sm:$0xff]  }
  0xa7   :  { %1938 = vmatprep.subr.bf16.mxu1 %v5872_v8  ;;  %v6014_v8 = vld [vmem:[#allocation7 + $0x1a4] ss:$48 sps:$4 sm:$0xff]  }
  0xa9   :  { %2107 = vmatpush1.bf16.msra.mxu0 %v5946_v26  ;;  %v5979_v26 = vld [vmem:[#allocation7 + $0x4e8] ss:$48 sps:$4 sm:$0xff]  }
  0xaa   :  { %1939 = vmatpush1.bf16.msra.mxu1 %v5870_v11  ;;  %2108 = vmatprep.subr.bf16.mxu0 %v5954_v28  ;;  %v6012_v11 = vld [vmem:[#allocation7 + $0x1a0] ss:$48 sps:$4 sm:$0xff]  }
  0xab   :  { %1940 = vmatprep.subr.bf16.mxu1 %v5878_v12  ;;  %v6020_v12 = vld [vmem:[#allocation7 + $0x204] ss:$48 sps:$4 sm:$0xff]   ;;  %v6036_v28 = vld [vmem:[#allocation7 + $0x320] ss:$48 sps:$4 sm:$0xff]  }
  0xad   :  { %2109 = vmatpush1.bf16.msra.mxu0 %v5952_v32  ;;  %v6042_v32 = vld [vmem:[#allocation7 + $0x380] ss:$48 sps:$4 sm:$0xff]  }
  0xae   :  { %1941 = vmatpush1.bf16.msra.mxu1 %v5876_v15  ;;  %2110 = vmatprep.subr.bf16.mxu0 %v5960_v33  ;;  %v6018_v15 = vld [vmem:[#allocation7 + $0x200] ss:$48 sps:$4 sm:$0xff]   ;;  %v6050_v33 = vld [vmem:[#allocation7 + $0x3e4] ss:$48 sps:$4 sm:$0xff]  }
  0xaf   :  { %1942 = vmatprep.subr.bf16.mxu1 %v5884_v16  ;;  %v6026_v16 = vld [vmem:[#allocation7 + $0x264] ss:$48 sps:$4 sm:$0xff]  }
  0xb1   :  { %2111 = vmatpush1.bf16.msra.mxu0 %v5958_v37  ;;  %v6048_v37 = vld [vmem:[#allocation7 + $0x3e0] ss:$48 sps:$4 sm:$0xff]  }
  0xb2   :  { %1943 = vmatpush1.bf16.msra.mxu1 %v5882_v19  ;;  %2112 = vmatprep.subr.bf16.mxu0 %v5966_v38  ;;  %v6024_v19 = vld [vmem:[#allocation7 + $0x260] ss:$48 sps:$4 sm:$0xff]   ;;  %v6056_v38 = vld [vmem:[#allocation7 + $0x444] ss:$48 sps:$4 sm:$0xff]  }
  0xb3   :  { %1944 = vmatprep.subr.bf16.mxu1 %v5890_v21  ;;  %v6032_v21 = vld [vmem:[#allocation7 + $0x2c4] ss:$48 sps:$4 sm:$0xff]  }
  0xb5   :  { %2113 = vmatpush1.bf16.msra.mxu0 %v5964_v41  ;;  %v6054_v41 = vld [vmem:[#allocation7 + $0x440] ss:$48 sps:$4 sm:$0xff]  }
  0xb6   :  { %1945 = vmatpush1.bf16.msra.mxu1 %v5888_v24  ;;  %2114 = vmatprep.subr.bf16.mxu0 %v5972_v42  ;;  %v6030_v24 = vld [vmem:[#allocation7 + $0x2c0] ss:$48 sps:$4 sm:$0xff]   ;;  %v6062_v42 = vld [vmem:[#allocation7 + $0x4a4] ss:$48 sps:$4 sm:$0xff]  }
  0xb7   :  { %1946 = vmatprep.subr.bf16.mxu1 %v5896_v25  ;;  %v6038_v25 = vld [vmem:[#allocation7 + $0x324] ss:$48 sps:$4 sm:$0xff]  }
  0xb9   :  { %2115 = vmatpush1.bf16.msra.mxu0 %v5970_v45  ;;  %v6060_v45 = vld [vmem:[#allocation7 + $0x4a0] ss:$48 sps:$4 sm:$0xff]  }
  0xba   :  { %1947 = vmatpush1.bf16.msra.mxu1 %v5894_v27  ;;  %2116 = vmatprep.subr.bf16.mxu0 %v5978_v46  ;;  %v5987_v27 = vld [vmem:[#allocation7 + $0x54c] ss:$48 sps:$4 sm:$0xff]   ;;  %v6068_v46 = vld [vmem:[#allocation7 + $0x504] ss:$48 sps:$4 sm:$0xff]  }
  0xbb   :  { %1975 = vmatprep.subr.bf16.mxu1 %v5902_v31  ;;  %v5993_v31 = vld [vmem:[#allocation7 + $0x5ac] ss:$48 sps:$4 sm:$0xff]  }
  0xbd   :  { %1965 = vmatmul.mubr.bf16.vlgmr.msra.gmra.mrb[0].mxu1 %v6877_v34  ;;  %2117 = vmatpush1.bf16.msra.mxu0 %v5976_v49  ;;  %v6066_v49 = vld [vmem:[#allocation7 + $0x500] ss:$48 sps:$4 sm:$0xff]  }
  0xbe   :  { %1976 = vmatpush1.bf16.msra.mxu1 %v5900_v35  ;;  %2007 = vmatprep.mubr.bf16.mxu1 %v6867_v20  ;;  %v5991_v35 = vld [vmem:[#allocation7 + $0x5a8] ss:$48 sps:$4 sm:$0xff]  }
  0xbf   :  { %1977 = vmatprep.subr.bf16.mxu1 %v5908_v36  ;;  %2118 = vmatprep.subr.bf16.mxu0 %v5984_v50  ;;  %v5999_v36 = vld [vmem:[#allocation7 + $0x60c] ss:$48 sps:$4 sm:$0xff]   ;;  %v6074_v50 = vld [vmem:[#allocation7 + $0x564] ss:$48 sps:$4 sm:$0xff]  }
  0xc1   :  { %2119 = vmatpush1.bf16.msra.mxu0 %v5982_v53  ;;  %v6072_v53 = vld [vmem:[#allocation7 + $0x560] ss:$48 sps:$4 sm:$0xff]  }
  0xc2   :  { %1978 = vmatpush1.bf16.msra.mxu1 %v5906_v39  ;;  %2233 = vmatprep.subr.bf16.mxu0 %v5990_v54  ;;  %v5997_v39 = vld [vmem:[#allocation7 + $0x608] ss:$48 sps:$4 sm:$0xff]   ;;  %v6080_v54 = vld [vmem:[#allocation7 + $0x5c4] ss:$48 sps:$4 sm:$0xff]  }
  0xc3   :  { %1979 = vmatprep.subr.bf16.mxu1 %v5914_v40  ;;  %v6005_v40 = vld [vmem:[#allocation7 + $0x66c] ss:$48 sps:$4 sm:$0xff]  }
  0xc4   :  { %2137 = vmatmul.mubr.bf16.vlgmr.msra.gmra.mrb[0].mxu0 %v6877_v34 }
  0xc5   :  { %2234 = vmatpush1.bf16.msra.mxu0 %v5988_v57  ;;  %2265 = vmatprep.mubr.bf16.mxu0 %v6867_v20  ;;  %v6078_v57 = vld [vmem:[#allocation7 + $0x5c0] ss:$48 sps:$4 sm:$0xff]  }
  0xc6   :  { %1980 = vmatpush1.bf16.msra.mxu1 %v5912_v43  ;;  %2235 = vmatprep.subr.bf16.mxu0 %v5996_v58  ;;  %v6003_v43 = vld [vmem:[#allocation7 + $0x668] ss:$48 sps:$4 sm:$0xff]   ;;  %v6086_v58 = vld [vmem:[#allocation7 + $0x624] ss:$48 sps:$4 sm:$0xff]  }
  0xc7   :  { %1981 = vmatprep.subr.bf16.mxu1 %v5920_v44  ;;  %v6011_v44 = vld [vmem:[#allocation7 + $0x6cc] ss:$48 sps:$4 sm:$0xff]  }
  0xc9   :  { %2236 = vmatpush1.bf16.msra.mxu0 %v5994_v62  ;;  %v6084_v62 = vld [vmem:[#allocation7 + $0x620] ss:$48 sps:$4 sm:$0xff]  }
  0xca   :  { %1982 = vmatpush1.bf16.msra.mxu1 %v5918_v47  ;;  %2237 = vmatprep.subr.bf16.mxu0 %v6002_v63  ;;  %v6009_v47 = vld [vmem:[#allocation7 + $0x6c8] ss:$48 sps:$4 sm:$0xff]   ;;  %v6092_v63 = vld [vmem:[#allocation7 + $0x684] ss:$48 sps:$4 sm:$0xff]  }
  0xcb   :  { %1983 = vmatprep.subr.bf16.mxu1 %v5926_v48  ;;  %v6017_v48 = vld [vmem:[#allocation7 + $0x72c] ss:$48 sps:$4 sm:$0xff]  }
  0xcd   :  { %2238 = vmatpush1.bf16.msra.mxu0 %v6000_v2  ;;  %v6090_v2 = vld [vmem:[#allocation7 + $0x680] ss:$48 sps:$4 sm:$0xff]  }
  0xce   :  { %1984 = vmatpush1.bf16.msra.mxu1 %v5924_v51  ;;  %2239 = vmatprep.subr.bf16.mxu0 %v6008_v4  ;;  %v6015_v51 = vld [vmem:[#allocation7 + $0x728] ss:$48 sps:$4 sm:$0xff]   ;;  %v6098_v4 = vld [vmem:[#allocation7 + $0x6e4] ss:$48 sps:$4 sm:$0xff]  }
  0xcf   :  { %1985 = vmatprep.subr.bf16.mxu1 %v5932_v52  ;;  %v6023_v52 = vld [vmem:[#allocation7 + $0x78c] ss:$48 sps:$4 sm:$0xff]  }
  0xd1   :  { %2240 = vmatpush1.bf16.msra.mxu0 %v6006_v7  ;;  %v6096_v7 = vld [vmem:[#allocation7 + $0x6e0] ss:$48 sps:$4 sm:$0xff]  }
  0xd2   :  { %1986 = vmatpush1.bf16.msra.mxu1 %v5930_v55  ;;  %2241 = vmatprep.subr.bf16.mxu0 %v6014_v8  ;;  %v6021_v55 = vld [vmem:[#allocation7 + $0x788] ss:$48 sps:$4 sm:$0xff]   ;;  %v6104_v8 = vld [vmem:[#allocation7 + $0x744] ss:$48 sps:$4 sm:$0xff]  }
  0xd3   :  { %1987 = vmatprep.subr.bf16.mxu1 %v5938_v56  ;;  %v6029_v56 = vld [vmem:[#allocation7 + $0x7ec] ss:$48 sps:$4 sm:$0xff]  }
  0xd5   :  { %2242 = vmatpush1.bf16.msra.mxu0 %v6012_v11  ;;  %v6102_v11 = vld [vmem:[#allocation7 + $0x740] ss:$48 sps:$4 sm:$0xff]  }
  0xd6   :  { %1988 = vmatpush1.bf16.msra.mxu1 %v5936_v59  ;;  %2243 = vmatprep.subr.bf16.mxu0 %v6020_v12  ;;  %v6027_v59 = vld [vmem:[#allocation7 + $0x7e8] ss:$48 sps:$4 sm:$0xff]   ;;  %v6110_v12 = vld [vmem:[#allocation7 + $0x7a4] ss:$48 sps:$4 sm:$0xff]  }
  0xd7   :  { %1989 = vmatprep.subr.bf16.mxu1 %v5945_v60  ;;  %v6035_v60 = vld [vmem:[#allocation7 + $0x84c] ss:$48 sps:$4 sm:$0xff]  }
  0xd9   :  { %2244 = vmatpush1.bf16.msra.mxu0 %v6018_v15  ;;  %v6108_v15 = vld [vmem:[#allocation7 + $0x7a0] ss:$48 sps:$4 sm:$0xff]  }
  0xda   :  { %1990 = vmatpush1.bf16.msra.mxu1 %v5943_v0  ;;  %2245 = vmatprep.subr.bf16.mxu0 %v6026_v16  ;;  %v6033_v0 = vld [vmem:[#allocation7 + $0x848] ss:$48 sps:$4 sm:$0xff]   ;;  %v6116_v16 = vld [vmem:[#allocation7 + $0x804] ss:$48 sps:$4 sm:$0xff]  }
  0xdb   :  { %1991 = vmatprep.subr.bf16.mxu1 %v5951_v1  ;;  %v6041_v1 = vld [vmem:[#allocation7 + $0x8ac] ss:$48 sps:$4 sm:$0xff]  }
  0xdd   :  { %2246 = vmatpush1.bf16.msra.mxu0 %v6024_v19  ;;  %v6114_v19 = vld [vmem:[#allocation7 + $0x800] ss:$48 sps:$4 sm:$0xff]  }
  0xde   :  { %1992 = vmatpush1.bf16.msra.mxu1 %v5949_v5  ;;  %2247 = vmatprep.subr.bf16.mxu0 %v6032_v21  ;;  %v6039_v5 = vld [vmem:[#allocation7 + $0x8a8] ss:$48 sps:$4 sm:$0xff]   ;;  %v6122_v21 = vld [vmem:[#allocation7 + $0x864] ss:$48 sps:$4 sm:$0xff]  }
  0xdf   :  { %1993 = vmatprep.subr.bf16.mxu1 %v5957_v6  ;;  %v6047_v6 = vld [vmem:[#allocation7 + $0x1c] ss:$48 sps:$4 sm:$0xff]  }
  0xe1   :  { %2248 = vmatpush1.bf16.msra.mxu0 %v6030_v24  ;;  %v6120_v24 = vld [vmem:[#allocation7 + $0x860] ss:$48 sps:$4 sm:$0xff]  }
  0xe2   :  { %1994 = vmatpush1.bf16.msra.mxu1 %v5955_v9  ;;  %2249 = vmatprep.subr.bf16.mxu0 %v6038_v25  ;;  %v6045_v9 = vld [vmem:[#allocation7 + $0x18] ss:$48 sps:$4 sm:$0xff]   ;;  %v6128_v25 = vld [vmem:[#allocation7 + $0x8c4] ss:$48 sps:$4 sm:$0xff]  }
  0xe3   :  { %1995 = vmatprep.subr.bf16.mxu1 %v5963_v10  ;;  %v6053_v10 = vld [vmem:[#allocation7 + $0x7c] ss:$48 sps:$4 sm:$0xff]  }
  0xe5   :  { %2250 = vmatpush1.bf16.msra.mxu0 %v6036_v28  ;;  %v6126_v28 = vld [vmem:[#allocation7 + $0x8c0] ss:$48 sps:$4 sm:$0xff]  }
  0xe6   :  { %1996 = vmatpush1.bf16.msra.mxu1 %v5961_v13  ;;  %2251 = vmatprep.subr.bf16.mxu0 %v6044_v29  ;;  %v6051_v13 = vld [vmem:[#allocation7 + $0x78] ss:$48 sps:$4 sm:$0xff]   ;;  %v6137_v29 = vld [vmem:[#allocation10 + $0x4] ss:$12 sps:$4 sm:$0xff]  }
  0xe7   :  { %1997 = vmatprep.subr.bf16.mxu1 %v5969_v14  ;;  %v6059_v14 = vld [vmem:[#allocation7 + $0xdc] ss:$48 sps:$4 sm:$0xff]  }
  0xe9   :  { %2252 = vmatpush1.bf16.msra.mxu0 %v6042_v32  ;;  %v6135_v32 = vld [vmem:[#allocation10] ss:$12 sps:$4 sm:$0xff]  }
  0xea   :  { %1998 = vmatpush1.bf16.msra.mxu1 %v5967_v17  ;;  %2253 = vmatprep.subr.bf16.mxu0 %v6050_v33  ;;  %v6057_v17 = vld [vmem:[#allocation7 + $0xd8] ss:$48 sps:$4 sm:$0xff]  }
  0xeb   :  { %1999 = vmatprep.subr.bf16.mxu1 %v5975_v18  ;;  %v6065_v18 = vld [vmem:[#allocation7 + $0x13c] ss:$48 sps:$4 sm:$0xff]   ;;  %v6143_v33 = vld [vmem:[#allocation10 + $0x1c] ss:$12 sps:$4 sm:$0xff]  }
  0xed   :  { %2254 = vmatpush1.bf16.msra.mxu0 %v6048_v37  ;;  %v6141_v37 = vld [vmem:[#allocation10 + $0x18] ss:$12 sps:$4 sm:$0xff]  }
  0xee   :  { %2000 = vmatpush1.bf16.msra.mxu1 %v5973_v22  ;;  %2255 = vmatprep.subr.bf16.mxu0 %v6056_v38  ;;  %v6063_v22 = vld [vmem:[#allocation7 + $0x138] ss:$48 sps:$4 sm:$0xff]   ;;  %v6149_v38 = vld [vmem:[#allocation10 + $0x34] ss:$12 sps:$4 sm:$0xff]  }
  0xef   :  { %2001 = vmatprep.subr.bf16.mxu1 %v5981_v23  ;;  %v6071_v23 = vld [vmem:[#allocation7 + $0x19c] ss:$48 sps:$4 sm:$0xff]  }
  0xf1   :  { %2256 = vmatpush1.bf16.msra.mxu0 %v6054_v41  ;;  %v6147_v41 = vld [vmem:[#allocation10 + $0x30] ss:$12 sps:$4 sm:$0xff]  }
  0xf2   :  { %2002 = vmatpush1.bf16.msra.mxu1 %v5979_v26  ;;  %2257 = vmatprep.subr.bf16.mxu0 %v6062_v42  ;;  %v6069_v26 = vld [vmem:[#allocation7 + $0x198] ss:$48 sps:$4 sm:$0xff]  }
  0xf3   :  { %2003 = vmatprep.subr.bf16.mxu1 %v5987_v27  ;;  %v6077_v27 = vld [vmem:[#allocation7 + $0x1fc] ss:$48 sps:$4 sm:$0xff]   ;;  %v6155_v42 = vld [vmem:[#allocation10 + $0x4c] ss:$12 sps:$4 sm:$0xff]  }
  0xf5   :  { %2258 = vmatpush1.bf16.msra.mxu0 %v6060_v45  ;;  %v6153_v45 = vld [vmem:[#allocation10 + $0x48] ss:$12 sps:$4 sm:$0xff]  }
  0xf6   :  { %2004 = vmatpush1.bf16.msra.mxu1 %v5985_v30  ;;  %2259 = vmatprep.subr.bf16.mxu0 %v6068_v46  ;;  %v6075_v30 = vld [vmem:[#allocation7 + $0x1f8] ss:$48 sps:$4 sm:$0xff]   ;;  %v6161_v46 = vld [vmem:[#allocation10 + $0x64] ss:$12 sps:$4 sm:$0xff]  }
  0xf7   :  { %2005 = vmatprep.subr.bf16.mxu1 %v5993_v31  ;;  %v6083_v31 = vld [vmem:[#allocation7 + $0x25c] ss:$48 sps:$4 sm:$0xff]  }
  0xf9   :  { %2260 = vmatpush1.bf16.msra.mxu0 %v6066_v49  ;;  %v6159_v49 = vld [vmem:[#allocation10 + $0x60] ss:$12 sps:$4 sm:$0xff]  }
  0xfa   :  { %2006 = vmatpush1.bf16.msra.mxu1 %v5991_v35  ;;  %2261 = vmatprep.subr.bf16.mxu0 %v6074_v50  ;;  %v6081_v35 = vld [vmem:[#allocation7 + $0x258] ss:$48 sps:$4 sm:$0xff]  }
  0xfb   :  { %2018 = vmatprep.subr.bf16.mxu1 %v5999_v36  ;;  %v6089_v36 = vld [vmem:[#allocation7 + $0x2bc] ss:$48 sps:$4 sm:$0xff]   ;;  %v6167_v50 = vld [vmem:[#allocation10 + $0x7c] ss:$12 sps:$4 sm:$0xff]  }
  0xfd   :  { %2008 = vmatmul.mubr.bf16.vlgmr.msra.gmra.mrb[4].mxu1 %v6871_v61  ;;  %2262 = vmatpush1.bf16.msra.mxu0 %v6072_v53  ;;  %v6165_v53 = vld [vmem:[#allocation10 + $0x78] ss:$12 sps:$4 sm:$0xff]  }
  0xfe   :  { %2019 = vmatpush1.bf16.msra.mxu1 %v5997_v39  ;;  %2050 = vmatprep.mubr.bf16.mxu1 %v6767_v3  ;;  %v6087_v39 = vld [vmem:[#allocation7 + $0x2b8] ss:$48 sps:$4 sm:$0xff]  }
  0xff   :  { %2020 = vmatprep.subr.bf16.mxu1 %v6005_v40  ;;  %2263 = vmatprep.subr.bf16.mxu0 %v6080_v54  ;;  %v6095_v40 = vld [vmem:[#allocation7 + $0x31c] ss:$48 sps:$4 sm:$0xff]  }
 0x100   :  { %v6173_v54 = vld [vmem:[#allocation10 + $0x94] ss:$12 sps:$4 sm:$0xff]  }
 0x101   :  { %2264 = vmatpush1.bf16.msra.mxu0 %v6078_v57  ;;  %v6171_v57 = vld [vmem:[#allocation10 + $0x90] ss:$12 sps:$4 sm:$0xff]  }
 0x102   :  { %2021 = vmatpush1.bf16.msra.mxu1 %v6003_v43  ;;  %2276 = vmatprep.subr.bf16.mxu0 %v6086_v58  ;;  %v6093_v43 = vld [vmem:[#allocation7 + $0x318] ss:$48 sps:$4 sm:$0xff]  }
 0x103   :  { %2022 = vmatprep.subr.bf16.mxu1 %v6011_v44  ;;  %v6101_v44 = vld [vmem:[#allocation7 + $0x37c] ss:$48 sps:$4 sm:$0xff]   ;;  %v6179_v58 = vld [vmem:[#allocation10 + $0xac] ss:$12 sps:$4 sm:$0xff]  }
 0x104   :  { %2266 = vmatmul.mubr.bf16.vlgmr.msra.gmra.mrb[4].mxu0 %v6871_v61 }
 0x105   :  { %2277 = vmatpush1.bf16.msra.mxu0 %v6084_v62  ;;  %2308 = vmatprep.mubr.bf16.mxu0 %v6767_v3  ;;  %v6177_v62 = vld [vmem:[#allocation10 + $0xa8] ss:$12 sps:$4 sm:$0xff]  }
 0x106   :  { %2023 = vmatpush1.bf16.msra.mxu1 %v6009_v47  ;;  %2278 = vmatprep.subr.bf16.mxu0 %v6092_v63  ;;  %v6099_v47 = vld [vmem:[#allocation7 + $0x378] ss:$48 sps:$4 sm:$0xff]   ;;  %v6185_v63 = vld [vmem:[#allocation10 + $0xc4] ss:$12 sps:$4 sm:$0xff]  }
 0x107   :  { %2024 = vmatprep.subr.bf16.mxu1 %v6017_v48  ;;  %v6107_v48 = vld [vmem:[#allocation7 + $0x3dc] ss:$48 sps:$4 sm:$0xff]  }
 0x109   :  { %2279 = vmatpush1.bf16.msra.mxu0 %v6090_v2  ;;  %v6183_v2 = vld [vmem:[#allocation10 + $0xc0] ss:$12 sps:$4 sm:$0xff]  }
 0x10a   :  { %2025 = vmatpush1.bf16.msra.mxu1 %v6015_v51  ;;  %2280 = vmatprep.subr.bf16.mxu0 %v6098_v4  ;;  %v6105_v51 = vld [vmem:[#allocation7 + $0x3d8] ss:$48 sps:$4 sm:$0xff]  }
 0x10b   :  { %2026 = vmatprep.subr.bf16.mxu1 %v6023_v52  ;;  %v6113_v52 = vld [vmem:[#allocation7 + $0x43c] ss:$48 sps:$4 sm:$0xff]   ;;  %v6191_v4 = vld [vmem:[#allocation10 + $0xdc] ss:$12 sps:$4 sm:$0xff]  }
 0x10d   :  { %2281 = vmatpush1.bf16.msra.mxu0 %v6096_v7  ;;  %v6189_v7 = vld [vmem:[#allocation10 + $0xd8] ss:$12 sps:$4 sm:$0xff]  }
 0x10e   :  { %2027 = vmatpush1.bf16.msra.mxu1 %v6021_v55  ;;  %2282 = vmatprep.subr.bf16.mxu0 %v6104_v8  ;;  %v6111_v55 = vld [vmem:[#allocation7 + $0x438] ss:$48 sps:$4 sm:$0xff]   ;;  %v6197_v8 = vld [vmem:[#allocation10 + $0xf4] ss:$12 sps:$4 sm:$0xff]  }
 0x10f   :  { %2028 = vmatprep.subr.bf16.mxu1 %v6029_v56  ;;  %v6119_v56 = vld [vmem:[#allocation7 + $0x49c] ss:$48 sps:$4 sm:$0xff]  }
 0x111   :  { %2283 = vmatpush1.bf16.msra.mxu0 %v6102_v11  ;;  %v6195_v11 = vld [vmem:[#allocation10 + $0xf0] ss:$12 sps:$4 sm:$0xff]  }
 0x112   :  { %2029 = vmatpush1.bf16.msra.mxu1 %v6027_v59  ;;  %2284 = vmatprep.subr.bf16.mxu0 %v6110_v12  ;;  %v6117_v59 = vld [vmem:[#allocation7 + $0x498] ss:$48 sps:$4 sm:$0xff]  }
 0x113   :  { %2030 = vmatprep.subr.bf16.mxu1 %v6035_v60  ;;  %v6125_v60 = vld [vmem:[#allocation7 + $0x4fc] ss:$48 sps:$4 sm:$0xff]   ;;  %v6138_v12 = vld [vmem:[#allocation7 + $0x618] ss:$48 sps:$4 sm:$0xff]  }
 0x115   :  { %2285 = vmatpush1.bf16.msra.mxu0 %v6108_v15  ;;  %v6201_v15 = vld [vmem:[#allocation10 + $0x108] ss:$12 sps:$4 sm:$0xff]  }
 0x116   :  { %2031 = vmatpush1.bf16.msra.mxu1 %v6033_v0  ;;  %2286 = vmatprep.subr.bf16.mxu0 %v6116_v16  ;;  %v6123_v0 = vld [vmem:[#allocation7 + $0x4f8] ss:$48 sps:$4 sm:$0xff]   ;;  %v6209_v16 = vld [vmem:[#allocation10 + $0x124] ss:$12 sps:$4 sm:$0xff]  }
 0x117   :  { %2032 = vmatprep.subr.bf16.mxu1 %v6041_v1  ;;  %v6131_v1 = vld [vmem:[#allocation7 + $0x55c] ss:$48 sps:$4 sm:$0xff]  }
 0x119   :  { %2287 = vmatpush1.bf16.msra.mxu0 %v6114_v19  ;;  %v6207_v19 = vld [vmem:[#allocation10 + $0x120] ss:$12 sps:$4 sm:$0xff]  }
 0x11a   :  { %2033 = vmatpush1.bf16.msra.mxu1 %v6039_v5  ;;  %2288 = vmatprep.subr.bf16.mxu0 %v6122_v21  ;;  %v6129_v5 = vld [vmem:[#allocation7 + $0x558] ss:$48 sps:$4 sm:$0xff]  }
 0x11b   :  { %2147 = vmatprep.subr.bf16.mxu1 %v6047_v6  ;;  %v6134_v6 = vld [vmem:[#allocation7 + $0x5bc] ss:$48 sps:$4 sm:$0xff]   ;;  %v6215_v21 = vld [vmem:[#allocation10 + $0x13c] ss:$12 sps:$4 sm:$0xff]  }
 0x11d   :  { %2051 = vmatmul.mubr.bf16.vlgmr.msra.gmra.mrb[4].mxu1 %v6877_v34  ;;  %2289 = vmatpush1.bf16.msra.mxu0 %v6120_v24  ;;  %v6213_v24 = vld [vmem:[#allocation10 + $0x138] ss:$12 sps:$4 sm:$0xff]  }
 0x11e   :  { %2148 = vmatpush1.bf16.msra.mxu1 %v6045_v9  ;;  %2179 = vmatprep.mubr.bf16.mxu1 %v6867_v20  ;;  %v6132_v9 = vld [vmem:[#allocation7 + $0x5b8] ss:$48 sps:$4 sm:$0xff]  }
 0x11f   :  { %2149 = vmatprep.subr.bf16.mxu1 %v6053_v10  ;;  %2290 = vmatprep.subr.bf16.mxu0 %v6128_v25  ;;  %v6140_v10 = vld [vmem:[#allocation7 + $0x61c] ss:$48 sps:$4 sm:$0xff]  }
 0x120   :  { %v6221_v25 = vld [vmem:[#allocation10 + $0x154] ss:$12 sps:$4 sm:$0xff]  }
 0x121   :  { %2291 = vmatpush1.bf16.msra.mxu0 %v6126_v28  ;;  %v6219_v28 = vld [vmem:[#allocation10 + $0x150] ss:$12 sps:$4 sm:$0xff]  }
 0x122   :  { %2150 = vmatpush1.bf16.msra.mxu1 %v6051_v13  ;;  %4378 = vmatprep.subr.bf16.mxu0 %v6137_v29  ;;  %v6203_v13 = vld [vmem:[#allocation10 + $0x10c] ss:$12 sps:$4 sm:$0xff]  }
 0x123   :  { %2151 = vmatprep.subr.bf16.mxu1 %v6059_v14  ;;  %v6146_v14 = vld [vmem:[#allocation7 + $0x67c] ss:$48 sps:$4 sm:$0xff]   ;;  %v6227_v29 = vld [vmem:[#allocation10 + $0x16c] ss:$12 sps:$4 sm:$0xff]  }
 0x124   :  { %2309 = vmatmul.mubr.bf16.vlgmr.msra.gmra.mrb[4].mxu0 %v6877_v34 }
 0x125   :  { %4379 = vmatpush1.bf16.msra.mxu0 %v6135_v32  ;;  %v6225_v32 = vld [vmem:[#allocation10 + $0x168] ss:$12 sps:$4 sm:$0xff]  }
 0x126   :  { %2152 = vmatpush1.bf16.msra.mxu1 %v6057_v17  ;;  %4380 = vmatprep.subr.bf16.mxu0 %v6143_v33  ;;  %v6144_v17 = vld [vmem:[#allocation7 + $0x678] ss:$48 sps:$4 sm:$0xff]   ;;  %v6257_v33 = vld [vmem:[#allocation10 + $0x184] ss:$12 sps:$4 sm:$0xff]  }
 0x127   :  { %2153 = vmatprep.subr.bf16.mxu1 %v6065_v18  ;;  %v6152_v18 = vld [vmem:[#allocation7 + $0x6dc] ss:$48 sps:$4 sm:$0xff]  }
 0x129   :  { %4381 = vmatpush1.bf16.msra.mxu0 %v6141_v37  ;;  %v6174_v37 = vld [vmem:[#allocation7 + $0x858] ss:$48 sps:$4 sm:$0xff]  }
 0x12a   :  { %2154 = vmatpush1.bf16.msra.mxu1 %v6063_v22  ;;  %4382 = vmatprep.subr.bf16.mxu0 %v6149_v38  ;;  %v6150_v22 = vld [vmem:[#allocation7 + $0x6d8] ss:$48 sps:$4 sm:$0xff]   ;;  %v6182_v38 = vld [vmem:[#allocation7 + $0x8bc] ss:$48 sps:$4 sm:$0xff]  }
 0x12b   :  { %2155 = vmatprep.subr.bf16.mxu1 %v6071_v23  ;;  %v6158_v23 = vld [vmem:[#allocation7 + $0x73c] ss:$48 sps:$4 sm:$0xff]  }
 0x12d   :  { %4383 = vmatpush1.bf16.msra.mxu0 %v6147_v41  ;;  %v6186_v41 = vld [vmem:[#allocation7 + $0x28] ss:$48 sps:$4 sm:$0xff]  }
 0x12e   :  { %2156 = vmatpush1.bf16.msra.mxu1 %v6069_v26  ;;  %4384 = vmatprep.subr.bf16.mxu0 %v6155_v42  ;;  %v6156_v26 = vld [vmem:[#allocation7 + $0x738] ss:$48 sps:$4 sm:$0xff]   ;;  %v6194_v42 = vld [vmem:[#allocation7 + $0x8c] ss:$48 sps:$4 sm:$0xff]  }
 0x12f   :  { %2157 = vmatprep.subr.bf16.mxu1 %v6077_v27  ;;  %v6164_v27 = vld [vmem:[#allocation7 + $0x79c] ss:$48 sps:$4 sm:$0xff]  }
 0x131   :  { %4385 = vmatpush1.bf16.msra.mxu0 %v6153_v45  ;;  %v6198_v45 = vld [vmem:[#allocation7 + $0xe8] ss:$48 sps:$4 sm:$0xff]  }
 0x132   :  { %2158 = vmatpush1.bf16.msra.mxu1 %v6075_v30  ;;  %4386 = vmatprep.subr.bf16.mxu0 %v6161_v46  ;;  %v6162_v30 = vld [vmem:[#allocation7 + $0x798] ss:$48 sps:$4 sm:$0xff]   ;;  %v389_v46 = vlaneseq }
 0x133   :  { %2159 = vmatprep.subr.bf16.mxu1 %v6083_v31  ;;  %v6170_v31 = vld [vmem:[#allocation7 + $0x7fc] ss:$48 sps:$4 sm:$0xff]  }
 0x135   :  { %4387 = vmatpush1.bf16.msra.mxu0 %v6159_v49  ;;  %v6895_v49 = vshrl.u32 %v389_v46, 7 }
 0x136   :  { %2160 = vmatpush1.bf16.msra.mxu1 %v6081_v35  ;;  %4388 = vmatprep.subr.bf16.mxu0 %v6167_v50  ;;  %v6168_v35 = vld [vmem:[#allocation7 + $0x7f8] ss:$48 sps:$4 sm:$0xff]   ;;  %v6212_v50 = vld [vmem:[#allocation7 + $0x1ac] ss:$48 sps:$4 sm:$0xff]  }
 0x137   :  { %2161 = vmatprep.subr.bf16.mxu1 %v6089_v36  ;;  %v6176_v36 = vld [vmem:[#allocation7 + $0x85c] ss:$48 sps:$4 sm:$0xff]  }
 0x139   :  { %4389 = vmatpush1.bf16.msra.mxu0 %v6165_v53  ;;  %v6900_v53 = vsub.s32 0, %v6895_v49 }
 0x13a   :  { %2162 = vmatpush1.bf16.msra.mxu1 %v6087_v39  ;;  %4390 = vmatprep.subr.bf16.mxu0 %v6173_v54  ;;  %v6180_v39 = vld [vmem:[#allocation7 + $0x8b8] ss:$48 sps:$4 sm:$0xff]   ;;  %v6903_v54 = vsub.s32 1, %v6895_v49 }
 0x13b   :  { %2163 = vmatprep.subr.bf16.mxu1 %v6095_v40  ;;  %v6188_v40 = vld [vmem:[#allocation7 + $0x2c] ss:$48 sps:$4 sm:$0xff]  }
 0x13d   :  { %4391 = vmatpush1.bf16.msra.mxu0 %v6171_v57  ;;  %v6224_v57 = vld [vmem:[#allocation7 + $0x26c] ss:$48 sps:$4 sm:$0xff]  }
 0x13e   :  { %2164 = vmatpush1.bf16.msra.mxu1 %v6093_v43  ;;  %4392 = vmatprep.subr.bf16.mxu0 %v6179_v58  ;;  %v6192_v43 = vld [vmem:[#allocation7 + $0x88] ss:$48 sps:$4 sm:$0xff]  }
 0x13f   :  { %2165 = vmatprep.subr.bf16.mxu1 %v6101_v44  ;;  %v6200_v44 = vld [vmem:[#allocation7 + $0xec] ss:$48 sps:$4 sm:$0xff]  }
 0x141   :  { %4393 = vmatpush1.bf16.msra.mxu0 %v6177_v62 }
 0x142   :  { %2166 = vmatpush1.bf16.msra.mxu1 %v6099_v47  ;;  %4394 = vmatprep.subr.bf16.mxu0 %v6185_v63  ;;  %v6206_v47 = vld [vmem:[#allocation7 + $0x14c] ss:$48 sps:$4 sm:$0xff]   ;;  %v6222_v63 = vld [vmem:[#allocation7 + $0x268] ss:$48 sps:$4 sm:$0xff]  }
 0x143   :  { %2167 = vmatprep.subr.bf16.mxu1 %v6107_v48  ;;  %v6204_v48 = vld [vmem:[#allocation7 + $0x148] ss:$48 sps:$4 sm:$0xff]  }
 0x145   :  { %4395 = vmatpush1.bf16.msra.mxu0 %v6183_v2 }
 0x146   :  { %2168 = vmatpush1.bf16.msra.mxu1 %v6105_v51  ;;  %4396 = vmatprep.subr.bf16.mxu0 %v6191_v4  ;;  %v6210_v51 = vld [vmem:[#allocation7 + $0x1a8] ss:$48 sps:$4 sm:$0xff]  }
 0x147   :  { %2169 = vmatprep.subr.bf16.mxu1 %v6113_v52  ;;  %v6897_v52 = vld [vmem:[#allocation9] sm:$0xff] }
 0x148   :  { %v396_v58 = vrot.slane %v6897_v52, %v6903_v54 }
 0x149   :  { %4397 = vmatpush1.bf16.msra.mxu0 %v6189_v7  ;;  %v6228_v7 = vld [vmem:[#allocation7 + $0x2c8] ss:$48 sps:$4 sm:$0xff]  }
 0x14a   :  { %2170 = vmatpush1.bf16.msra.mxu1 %v6111_v55  ;;  %4398 = vmatprep.subr.bf16.mxu0 %v6197_v8  ;;  %v6216_v55 = vld [vmem:[#allocation7 + $0x208] ss:$48 sps:$4 sm:$0xff]  }
 0x14b   :  { %2171 = vmatprep.subr.bf16.mxu1 %v6119_v56  ;;  %v392_v56 = vrot.slane %v6897_v52, %v6900_v53 }
 0x14d   :  { %4399 = vmatpush1.bf16.msra.mxu0 %v6195_v11  ;;  %v6233_v11 = vld [vmem:[#allocation7 + $0x32c] ss:$48 sps:$4 sm:$0xff]  }
 0x14e   :  { %2172 = vmatpush1.bf16.msra.mxu1 %v6117_v59  ;;  %4400 = vmatprep.subr.bf16.mxu0 %v6203_v13 }
 0x14f   :  { %2173 = vmatprep.subr.bf16.mxu1 %v6125_v60 }
 0x151   :  { %4401 = vmatpush1.bf16.msra.mxu0 %v6201_v15  ;;  %v6231_v15 = vld [vmem:[#allocation7 + $0x328] ss:$48 sps:$4 sm:$0xff]  }
 0x152   :  { %2174 = vmatpush1.bf16.msra.mxu1 %v6123_v0  ;;  %4402 = vmatprep.subr.bf16.mxu0 %v6209_v16  ;;  %v6230_v0 = vld [vmem:[#allocation7 + $0x2cc] ss:$48 sps:$4 sm:$0xff]  }
 0x153   :  { %2175 = vmatprep.subr.bf16.mxu1 %v6131_v1  ;;  %v6255_v16 = vld [vmem:[#allocation10 + $0x180] ss:$12 sps:$4 sm:$0xff]  }
 0x155   :  { %4403 = vmatpush1.bf16.msra.mxu0 %v6207_v19  ;;  %v6261_v19 = vld [vmem:[#allocation10 + $0x198] ss:$12 sps:$4 sm:$0xff]  }
 0x156   :  { %2176 = vmatpush1.bf16.msra.mxu1 %v6129_v5  ;;  %4404 = vmatprep.subr.bf16.mxu0 %v6215_v21  ;;  %v6234_v21 = vld [vmem:[#allocation7 + $0x388] ss:$48 sps:$4 sm:$0xff]  }
 0x157   :  { %2177 = vmatprep.subr.bf16.mxu1 %v6134_v6 }
 0x159   :  { %4405 = vmatpush1.bf16.msra.mxu0 %v6213_v24  ;;  %v407_v24 = vsub.s32 4, %v6895_v49 }
 0x15a   :  { %2178 = vmatpush1.bf16.msra.mxu1 %v6132_v9  ;;  %4406 = vmatprep.subr.bf16.mxu0 %v6221_v25  ;;  %v411_v25 = vsub.s32 5, %v6895_v49 }
 0x15b   :  { %2190 = vmatprep.subr.bf16.mxu1 %v6140_v10 }
 0x15d   :  { %2180 = vmatmul.mubr.bf16.vlgmr.msra.gmra.mrb[8].mxu1 %v6871_v61  ;;  %4407 = vmatpush1.bf16.msra.mxu0 %v6219_v28  ;;  %v6242_v28 = vld [vmem:[#allocation7 + $0x44c] ss:$48 sps:$4 sm:$0xff]  }
 0x15e   :  { %2191 = vmatpush1.bf16.msra.mxu1 %v6138_v12  ;;  %2222 = vmatprep.mubr.bf16.mxu1 %v6767_v3 }
 0x15f   :  { %2192 = vmatprep.subr.bf16.mxu1 %v6146_v14  ;;  %4408 = vmatprep.subr.bf16.mxu0 %v6227_v29  ;;  %v6275_v29 = vld [vmem:[#allocation10 + $0x1cc] ss:$12 sps:$4 sm:$0xff]  }
 0x161   :  { %4409 = vmatpush1.bf16.msra.mxu0 %v6225_v32  ;;  %v6240_v32 = vld [vmem:[#allocation7 + $0x448] ss:$48 sps:$4 sm:$0xff]  }
 0x162   :  { %2193 = vmatpush1.bf16.msra.mxu1 %v6144_v17  ;;  %4421 = vmatprep.subr.bf16.mxu0 %v6257_v33  ;;  %v6236_v17 = vld [vmem:[#allocation7 + $0x38c] ss:$48 sps:$4 sm:$0xff]   ;;  %v6273_v33 = vld [vmem:[#allocation10 + $0x1c8] ss:$12 sps:$4 sm:$0xff]  }
 0x163   :  { %2194 = vmatprep.subr.bf16.mxu1 %v6152_v18  ;;  %v6263_v18 = vld [vmem:[#allocation10 + $0x19c] ss:$12 sps:$4 sm:$0xff]  }
 0x166   :  { %2195 = vmatpush1.bf16.msra.mxu1 %v6150_v22  ;;  %v6239_v22 = vld [vmem:[#allocation7 + $0x3ec] ss:$48 sps:$4 sm:$0xff]  }
 0x167   :  { %2196 = vmatprep.subr.bf16.mxu1 %v6158_v23  ;;  %v6269_v23 = vld [vmem:[#allocation10 + $0x1b4] ss:$12 sps:$4 sm:$0xff]  }
 0x16a   :  { %2197 = vmatpush1.bf16.msra.mxu1 %v6156_v26  ;;  %v6237_v26 = vld [vmem:[#allocation7 + $0x3e8] ss:$48 sps:$4 sm:$0xff]  }
 0x16b   :  { %2198 = vmatprep.subr.bf16.mxu1 %v6164_v27  ;;  %v6267_v27 = vld [vmem:[#allocation10 + $0x1b0] ss:$12 sps:$4 sm:$0xff]  }
 0x16e   :  { %2199 = vmatpush1.bf16.msra.mxu1 %v6162_v30  ;;  %v408_v30 = vrot.slane %v6897_v52, %v407_v24  ;;  %v6276_v24 = vld [vmem:[#allocation7 + $0x748] ss:$48 sps:$4 sm:$0xff]  }
 0x16f   :  { %2200 = vmatprep.subr.bf16.mxu1 %v6170_v31  ;;  %v412_v31 = vrot.slane %v6897_v52, %v411_v25  ;;  %v6317_v25 = vld [vmem:[#allocation10 + $0x288] ss:$12 sps:$4 sm:$0xff]  }
 0x172   :  { %2201 = vmatpush1.bf16.msra.mxu1 %v6168_v35  ;;  %v6245_v35 = vld [vmem:[#allocation7 + $0x4ac] ss:$48 sps:$4 sm:$0xff]  }
 0x173   :  { %2202 = vmatprep.subr.bf16.mxu1 %v6176_v36  ;;  %v6281_v36 = vld [vmem:[#allocation10 + $0x1e4] ss:$12 sps:$4 sm:$0xff]  }
 0x176   :  { %2203 = vmatpush1.bf16.msra.mxu1 %v6174_v37 }
 0x177   :  { %2204 = vmatprep.subr.bf16.mxu1 %v6182_v38 }
 0x17a   :  { %2205 = vmatpush1.bf16.msra.mxu1 %v6180_v39 }
 0x17b   :  { %2319 = vmatprep.subr.bf16.mxu1 %v6188_v40 }
 0x17d   :  { %2223 = vmatmul.mubr.bf16.vlgmr.msra.gmra.mrb[8].mxu1 %v6877_v34 }
 0x17e   :  { %2320 = vmatpush1.bf16.msra.mxu1 %v6186_v41  ;;  %2351 = vmatprep.mubr.bf16.mxu1 %v6867_v20  ;;  %v6218_v20 = vld [vmem:[#allocation7 + $0x20c] ss:$48 sps:$4 sm:$0xff]  }
 0x17f   :  { %2321 = vmatprep.subr.bf16.mxu1 %v6194_v42  ;;  %v6279_v42 = vld [vmem:[#allocation10 + $0x1e0] ss:$12 sps:$4 sm:$0xff]  }
 0x182   :  { %2322 = vmatpush1.bf16.msra.mxu1 %v6192_v43 }
 0x183   :  { %2323 = vmatprep.subr.bf16.mxu1 %v6200_v44 }
 0x186   :  { %2324 = vmatpush1.bf16.msra.mxu1 %v6198_v45 }
 0x187   :  { %2325 = vmatprep.subr.bf16.mxu1 %v6206_v47  ;;  %v6243_v47 = vld [vmem:[#allocation7 + $0x4a8] ss:$48 sps:$4 sm:$0xff]  }
 0x18a   :  { %2326 = vmatpush1.bf16.msra.mxu1 %v6204_v48 }
 0x18b   :  { %2327 = vmatprep.subr.bf16.mxu1 %v6212_v50 }
 0x18e   :  { %2328 = vmatpush1.bf16.msra.mxu1 %v6210_v51  ;;  %v6287_v51 = vld [vmem:[#allocation10 + $0x1fc] ss:$12 sps:$4 sm:$0xff]  }
 0x18f   :  { %2329 = vmatprep.subr.bf16.mxu1 %v6218_v20  ;;  %v6248_v20 = vld [vmem:[#allocation7 + $0x50c] ss:$48 sps:$4 sm:$0xff]  }
 0x190   :  { %v1966_v59 = vpop.f32.mrb[0].mxu1 }
 0x191   :  { %v5714_v60 = vadd.f32 %v1966_v59, %v392_v56  ;;  %v1968_v62 = vpop.f32.mrb[1].mxu1  ;;  %v6285_v59 = vld [vmem:[#allocation10 + $0x1f8] ss:$12 sps:$4 sm:$0xff]  }
 0x192   :  { %v5715_v1 = vadd.f32 %v1968_v62, %v396_v58  ;;  %v1970_v2 = vpop.f32.mrb[2].mxu1  ;;  %2330 = vmatpush1.bf16.msra.mxu1 %v6216_v55 }
 0x193   :  { %v5716_v4 = vadd.f32 %v1970_v2, %v392_v56  ;;  %v1972_v5 = vpop.f32.mrb[3].mxu1  ;;  %2331 = vmatprep.subr.bf16.mxu1 %v6224_v57  ;;  %v2405_v8 = vmax.f32 %v5714_v60, 0.0  ;;  %v6246_v57 = vld [vmem:[#allocation7 + $0x508] ss:$48 sps:$4 sm:$0xff]   ;;  %v6251_v60 = vld [vmem:[#allocation7 + $0x56c] ss:$48 sps:$4 sm:$0xff]  }
 0x194   :  { %v5717_v6 = vadd.f32 %v1972_v5, %v396_v58  ;;  %v2406_v9 = vmax.f32 %v5715_v1, 0.0  ;;  %v6291_v1 = vld [vmem:[#allocation10 + $0x210] ss:$12 sps:$4 sm:$0xff]  }
 0x195   :  { %v2417_v10 = vmax.f32 %v5716_v4, 0.0  ;;  %v6254_v2 = vld [vmem:[#allocation7 + $0x5cc] ss:$48 sps:$4 sm:$0xff]   ;;  %v6299_v4 = vld [vmem:[#allocation10 + $0x22c] ss:$12 sps:$4 sm:$0xff]  }
 0x196   :  { %v2418_v12 = vmax.f32 %v5717_v6, 0.0  ;;  %2332 = vmatpush1.bf16.msra.mxu1 %v6222_v63  ;;  %v6293_v63 = vld [vmem:[#allocation10 + $0x214] ss:$12 sps:$4 sm:$0xff]   ;;  %v6252_v5 = vld [vmem:[#allocation7 + $0x5c8] ss:$48 sps:$4 sm:$0xff]  }
 0x197   :  { %v6909_v13 = vpack.c.bf16 %v2417_v10, %v2405_v8  ;;  %2333 = vmatprep.subr.bf16.mxu1 %v6230_v0  ;;  %v2138_v37 = vpop.f32.mrb[0].mxu0  ;;  %v6249_v0 = vld [vmem:[#allocation7 + $0x568] ss:$48 sps:$4 sm:$0xff]   ;;  %v6297_v6 = vld [vmem:[#allocation10 + $0x228] ss:$12 sps:$4 sm:$0xff]  }
 0x198   :  { %v6911_v14 = vpack.c.bf16 %v2418_v12, %v2406_v9  ;;  %v5722_v38 = vadd.f32 %v2138_v37, %v408_v30  ;;  %v2140_v39 = vpop.f32.mrb[1].mxu0  ;;  %v6305_v8 = vld [vmem:[#allocation10 + $0x244] ss:$12 sps:$4 sm:$0xff]   ;;  %v6303_v9 = vld [vmem:[#allocation10 + $0x240] ss:$12 sps:$4 sm:$0xff]  }
 0x199   :  { %v5723_v40 = vadd.f32 %v2140_v39, %v412_v31  ;;  %v2142_v41 = vpop.f32.mrb[2].mxu0  ;;  %v6258_v10 = vld [vmem:[#allocation7 + $0x628] ss:$48 sps:$4 sm:$0xff]   ;;  %v6266_v12 = vld [vmem:[#allocation7 + $0x68c] ss:$48 sps:$4 sm:$0xff]  }
 0x19a   :  { %2334 = vmatpush1.bf16.msra.mxu1 %v6228_v7  ;;  %4410 = vmatprep.mubr.bf16.mxu0 %v6911_v14  ;;  %v2409_v43 = vmax.f32 %v5722_v38, 0.0  ;;  %v5724_v44 = vadd.f32 %v2142_v41, %v408_v30  ;;  %v2144_v45 = vpop.f32.mrb[3].mxu0  ;;  %v6260_v7 = vld [vmem:[#allocation7 + $0x62c] ss:$48 sps:$4 sm:$0xff]   ;;  %v6288_v30 = vld [vmem:[#allocation7 + $0x808] ss:$48 sps:$4 sm:$0xff]  }
 0x19b   :  { %4411 = vmatmul.mubr.bf16.vlgmr.msra.gmra.mrb[8].mxu0 %v6909_v13  ;;  %2335 = vmatprep.subr.bf16.mxu1 %v6233_v11  ;;  %v2410_v48 = vmax.f32 %v5723_v40, 0.0  ;;  %v5725_v50 = vadd.f32 %v2144_v45, %v412_v31  ;;  %v6309_v11 = vld [vmem:[#allocation10 + $0x25c] ss:$12 sps:$4 sm:$0xff]   ;;  %v6327_v31 = vld [vmem:[#allocation10 + $0x2b8] ss:$12 sps:$4 sm:$0xff]  }
 0x19c   :  { %4422 = vmatpush1.bf16.msra.mxu0 %v6255_v16  ;;  %v2421_v55 = vmax.f32 %v5724_v44, 0.0  ;;  %v6264_v16 = vld [vmem:[#allocation7 + $0x688] ss:$48 sps:$4 sm:$0xff]   ;;  %v6302_v38 = vld [vmem:[#allocation7 + $0x8cc] ss:$48 sps:$4 sm:$0xff]  }
 0x19d   :  { %4423 = vmatprep.subr.bf16.mxu0 %v6263_v18  ;;  %v2422_v56 = vmax.f32 %v5725_v50, 0.0  ;;  %v6314_v18 = vld [vmem:[#allocation10 + $0x274] ss:$12 sps:$4 sm:$0xff]   ;;  %v6339_v37 = vld [vmem:[#allocation10 + $0x2ec] ss:$12 sps:$4 sm:$0xff]  }
 0x19e   :  { %2336 = vmatpush1.bf16.msra.mxu1 %v6231_v15  ;;  %v6919_v58 = vpack.c.bf16 %v2421_v55, %v2409_v43  ;;  %v6307_v15 = vld [vmem:[#allocation10 + $0x258] ss:$12 sps:$4 sm:$0xff]   ;;  %v6337_v39 = vld [vmem:[#allocation10 + $0x2e8] ss:$12 sps:$4 sm:$0xff]   ;;  %v6300_v40 = vld [vmem:[#allocation7 + $0x8c8] ss:$48 sps:$4 sm:$0xff]  }
 0x19f   :  { %2337 = vmatprep.subr.bf16.mxu1 %v6236_v17  ;;  %v6921_v62 = vpack.c.bf16 %v2422_v56, %v2410_v48  ;;  %v6272_v17 = vld [vmem:[#allocation7 + $0x6ec] ss:$48 sps:$4 sm:$0xff]   ;;  %v6310_v43 = vld [vmem:[#allocation10 + $0x8] ss:$12 sps:$4 sm:$0xff]   ;;  %v6320_v48 = vld [vmem:[#allocation10 + $0x38] ss:$12 sps:$4 sm:$0xff]  }
 0x1a0   :  { %4424 = vmatpush1.bf16.msra.mxu0 %v6261_v19  ;;  %v6270_v19 = vld [vmem:[#allocation7 + $0x6e8] ss:$48 sps:$4 sm:$0xff]   ;;  %v6344_v41 = vld [vmem:[#allocation10 + $0x304] ss:$12 sps:$4 sm:$0xff]   ;;  %v6928_v55 = vsub.s32 2, %v6895_v49 }
 0x1a1   :  { %4425 = vmatprep.subr.bf16.mxu0 %v6269_v23  ;;  %v6319_v23 = vld [vmem:[#allocation10 + $0x28c] ss:$12 sps:$4 sm:$0xff]   ;;  %v6321_v50 = vld [vmem:[#allocation10 + $0x110] ss:$12 sps:$4 sm:$0xff]   ;;  %v6330_v56 = vld [vmem:[#allocation10 + $0x68] ss:$12 sps:$4 sm:$0xff]  }
 0x1a2   :  { %2338 = vmatpush1.bf16.msra.mxu1 %v6234_v21  ;;  %v6312_v21 = vld [vmem:[#allocation10 + $0x270] ss:$12 sps:$4 sm:$0xff]   ;;  %v6311_v44 = vld [vmem:[#allocation10 + $0xe0] ss:$12 sps:$4 sm:$0xff]  }
 0x1a3   :  { %2339 = vmatprep.subr.bf16.mxu1 %v6239_v22  ;;  %v6278_v22 = vld [vmem:[#allocation7 + $0x74c] ss:$48 sps:$4 sm:$0xff]  }
 0x1a4   :  { %4426 = vmatpush1.bf16.msra.mxu0 %v6267_v27  ;;  %v6282_v27 = vld [vmem:[#allocation7 + $0x7a8] ss:$48 sps:$4 sm:$0xff]  }
 0x1a5   :  { %4427 = vmatprep.subr.bf16.mxu0 %v6275_v29  ;;  %v6329_v29 = vld [vmem:[#allocation10 + $0x2bc] ss:$12 sps:$4 sm:$0xff]   ;;  %v6315_v45 = vld [vmem:[#allocation10 + $0x20] ss:$12 sps:$4 sm:$0xff]  }
 0x1a6   :  { %2340 = vmatpush1.bf16.msra.mxu1 %v6237_v26  ;;  %v6324_v26 = vld [vmem:[#allocation10 + $0x2a4] ss:$12 sps:$4 sm:$0xff]  }
 0x1a7   :  { %2341 = vmatprep.subr.bf16.mxu1 %v6242_v28  ;;  %v6290_v28 = vld [vmem:[#allocation7 + $0x80c] ss:$48 sps:$4 sm:$0xff]  }
 0x1a8   :  { %4428 = vmatpush1.bf16.msra.mxu0 %v6273_v33  ;;  %v6334_v33 = vld [vmem:[#allocation10 + $0x2d4] ss:$12 sps:$4 sm:$0xff]  }
 0x1a9   :  { %4429 = vmatprep.subr.bf16.mxu0 %v6281_v36  ;;  %v6294_v36 = vld [vmem:[#allocation7 + $0x868] ss:$48 sps:$4 sm:$0xff]  }
 0x1aa   :  { %2342 = vmatpush1.bf16.msra.mxu1 %v6240_v32  ;;  %v6296_v32 = vld [vmem:[#allocation7 + $0x86c] ss:$48 sps:$4 sm:$0xff]  }
 0x1ab   :  { %2343 = vmatprep.subr.bf16.mxu1 %v6245_v35  ;;  %v6332_v35 = vld [vmem:[#allocation10 + $0x2d0] ss:$12 sps:$4 sm:$0xff]  }
 0x1ac   :  { %4430 = vmatpush1.bf16.msra.mxu0 %v6279_v42  ;;  %v6306_v42 = vld [vmem:[#allocation10 + $0xc8] ss:$12 sps:$4 sm:$0xff]  }
 0x1ad   :  { %4431 = vmatprep.subr.bf16.mxu0 %v6287_v51  ;;  %v6325_v51 = vld [vmem:[#allocation10 + $0x50] ss:$12 sps:$4 sm:$0xff]  }
 0x1ae   :  { %2344 = vmatpush1.bf16.msra.mxu1 %v6243_v47  ;;  %v6316_v47 = vld [vmem:[#allocation10 + $0xf8] ss:$12 sps:$4 sm:$0xff]  }
 0x1af   :  { %2345 = vmatprep.subr.bf16.mxu1 %v6248_v20  ;;  %v6326_v20 = vld [vmem:[#allocation10 + $0x128] ss:$12 sps:$4 sm:$0xff]  }
 0x1b0   :  { %4432 = vmatpush1.bf16.msra.mxu0 %v6285_v59 }
 0x1b1   :  { %4433 = vmatprep.subr.bf16.mxu0 %v6293_v63  ;;  %v6336_v63 = vld [vmem:[#allocation10 + $0x158] ss:$12 sps:$4 sm:$0xff]  }
 0x1b2   :  { %2346 = vmatpush1.bf16.msra.mxu1 %v6246_v57  ;;  %v400_v57 = vrot.slane %v6897_v52, %v6928_v55 }
 0x1b3   :  { %2347 = vmatprep.subr.bf16.mxu1 %v6251_v60  ;;  %v6335_v60 = vld [vmem:[#allocation10 + $0x80] ss:$12 sps:$4 sm:$0xff]  }
 0x1b4   :  { %4434 = vmatpush1.bf16.msra.mxu0 %v6291_v1 }
 0x1b5   :  { %4435 = vmatprep.subr.bf16.mxu0 %v6299_v4 }
 0x1b6   :  { %2348 = vmatpush1.bf16.msra.mxu1 %v6249_v0 }
 0x1b7   :  { %2349 = vmatprep.subr.bf16.mxu1 %v6254_v2 }
 0x1b8   :  { %4436 = vmatpush1.bf16.msra.mxu0 %v6297_v6  ;;  %v6340_v6 = vld [vmem:[#allocation10 + $0x98] ss:$12 sps:$4 sm:$0xff]  }
 0x1b9   :  { %4437 = vmatprep.subr.bf16.mxu0 %v6305_v8 }
 0x1ba   :  { %2350 = vmatpush1.bf16.msra.mxu1 %v6252_v5 }
 0x1bb   :  { %2362 = vmatprep.subr.bf16.mxu1 %v6260_v7 }
 0x1bc   :  { %4438 = vmatpush1.bf16.msra.mxu0 %v6303_v9  ;;  %v6341_v9 = vld [vmem:[#allocation10 + $0x170] ss:$12 sps:$4 sm:$0xff]  }
 0x1bd   :  { %2352 = vmatmul.mubr.bf16.vlgmr.msra.gmra.mrb[12].mxu1 %v6871_v61  ;;  %4439 = vmatprep.subr.bf16.mxu0 %v6309_v11  ;;  %v6284_v61 = vld [vmem:[#allocation7 + $0x7ac] ss:$48 sps:$4 sm:$0xff]  }
 0x1be   :  { %2363 = vmatpush1.bf16.msra.mxu1 %v6258_v10  ;;  %2394 = vmatprep.mubr.bf16.mxu1 %v6767_v3  ;;  %v6322_v3 = vld [vmem:[#allocation10 + $0x2a0] ss:$12 sps:$4 sm:$0xff]  }
 0x1bf   :  { %2364 = vmatprep.subr.bf16.mxu1 %v6266_v12 }
 0x1c0   :  { %4440 = vmatpush1.bf16.msra.mxu0 %v6307_v15 }
 0x1c1   :  { %4441 = vmatprep.subr.bf16.mxu0 %v6314_v18  ;;  %v6346_v18 = vld [vmem:[#allocation10 + $0x248] ss:$12 sps:$4 sm:$0xff]  }
 0x1c2   :  { %2365 = vmatpush1.bf16.msra.mxu1 %v6264_v16 }
 0x1c3   :  { %2366 = vmatprep.subr.bf16.mxu1 %v6272_v17 }
 0x1c4   :  { %4442 = vmatpush1.bf16.msra.mxu0 %v6312_v21  ;;  %v6342_v21 = vld [vmem:[#allocation10 + $0x300] ss:$12 sps:$4 sm:$0xff]  }
 0x1c5   :  { %4443 = vmatprep.subr.bf16.mxu0 %v6319_v23  ;;  %v6350_v23 = vld [vmem:[#allocation10 + $0x188] ss:$12 sps:$4 sm:$0xff]  }
 0x1c6   :  { %2367 = vmatpush1.bf16.msra.mxu1 %v6270_v19 }
 0x1c7   :  { %2368 = vmatprep.subr.bf16.mxu1 %v6278_v22  ;;  %v6349_v22 = vld [vmem:[#allocation10 + $0x31c] ss:$12 sps:$4 sm:$0xff]  }
 0x1c8   :  { %4444 = vmatpush1.bf16.msra.mxu0 %v6317_v25  ;;  %v6347_v25 = vld [vmem:[#allocation10 + $0x318] ss:$12 sps:$4 sm:$0xff]  }
 0x1c9   :  { %4445 = vmatprep.subr.bf16.mxu0 %v6324_v26  ;;  %v6355_v26 = vld [vmem:[#allocation10 + $0x1a0] ss:$12 sps:$4 sm:$0xff]  }
 0x1ca   :  { %2369 = vmatpush1.bf16.msra.mxu1 %v6276_v24  ;;  %v6351_v24 = vld [vmem:[#allocation10 + $0x260] ss:$12 sps:$4 sm:$0xff]  }
 0x1cb   :  { %2370 = vmatprep.subr.bf16.mxu1 %v6284_v61  ;;  %v6354_v61 = vld [vmem:[#allocation10 + $0x334] ss:$12 sps:$4 sm:$0xff]  }
 0x1cc   :  { %4446 = vmatpush1.bf16.msra.mxu0 %v6322_v3  ;;  %v6941_v3 = vld [vmem:[#allocation9 + $0x8] sm:$0xf] }
 0x1cd   :  { %4447 = vmatprep.subr.bf16.mxu0 %v6329_v29  ;;  %v6359_v29 = vld [vmem:[#allocation10 + $0x34c] ss:$12 sps:$4 sm:$0xff]  }
 0x1ce   :  { %2371 = vmatpush1.bf16.msra.mxu1 %v6282_v27  ;;  %v6356_v27 = vld [vmem:[#allocation10 + $0x278] ss:$12 sps:$4 sm:$0xff]  }
 0x1cf   :  { %2372 = vmatprep.subr.bf16.mxu1 %v6290_v28  ;;  %v6352_v28 = vld [vmem:[#allocation10 + $0x330] ss:$12 sps:$4 sm:$0xff]  }
 0x1d0   :  { %4448 = vmatpush1.bf16.msra.mxu0 %v6327_v31  ;;  %v424_v31 = vrot.slane %v6941_v3, %v6900_v53 }
 0x1d1   :  { %4449 = vmatprep.subr.bf16.mxu0 %v6334_v33  ;;  %v6357_v33 = vld [vmem:[#allocation10 + $0x348] ss:$12 sps:$4 sm:$0xff]  }
 0x1d2   :  { %2373 = vmatpush1.bf16.msra.mxu1 %v6288_v30  ;;  %v6360_v30 = vld [vmem:[#allocation10 + $0x1b8] ss:$12 sps:$4 sm:$0xff]  }
 0x1d3   :  { %2374 = vmatprep.subr.bf16.mxu1 %v6296_v32  ;;  %v428_v32 = vrot.slane %v6941_v3, %v6903_v54 }
 0x1d4   :  { %4450 = vmatpush1.bf16.msra.mxu0 %v6332_v35  ;;  %v6364_v35 = vld [vmem:[#allocation10 + $0x364] ss:$12 sps:$4 sm:$0xff]  }
 0x1d5   :  { %4451 = vmatprep.subr.bf16.mxu0 %v6339_v37  ;;  %v6365_v37 = vld [vmem:[#allocation10 + $0x1d0] ss:$12 sps:$4 sm:$0xff]  }
 0x1d6   :  { %2375 = vmatpush1.bf16.msra.mxu1 %v6294_v36 }
 0x1d7   :  { %2376 = vmatprep.subr.bf16.mxu1 %v6302_v38 }
 0x1d8   :  { %4452 = vmatpush1.bf16.msra.mxu0 %v6337_v39 }
 0x1d9   :  { %4464 = vmatprep.subr.bf16.mxu0 %v6344_v41 }
 0x1da   :  { %2377 = vmatpush1.bf16.msra.mxu1 %v6300_v40  ;;  %v6366_v40 = vld [vmem:[#allocation10 + $0x2a8] ss:$12 sps:$4 sm:$0xff]  }
 0x1db   :  { %5582 = vmatprep.subr.bf16.mxu1 %v6306_v42 }
 0x1dd   :  { %2395 = vmatmul.mubr.bf16.vlgmr.msra.gmra.mrb[12].mxu1 %v6877_v34  ;;  %v403_v34 = vsub.s32 3, %v6895_v49 }
 0x1de   :  { %5583 = vmatpush3.bf16.msra.mxu1 %v6310_v43  ;;  %4668 = vmatprep.mubr.bf16.mxu1 %v6911_v14  ;;  %v6331_v14 = vld [vmem:[#allocation10 + $0x140] ss:$12 sps:$4 sm:$0xff]  }
 0x1df   :  { %5584 = vmatprep.subr.bf16.mxu1 %v6311_v44  ;;  %v404_v59 = vrot.slane %v6897_v52, %v403_v34  ;;  %v6345_v52 = vld [vmem:[#allocation10 + $0xb0] ss:$12 sps:$4 sm:$0xff]   ;;  %v6362_v43 = vld [vmem:[#allocation10 + $0x360] ss:$12 sps:$4 sm:$0xff]  }
 0x1e2   :  { %5585 = vmatpush3.bf16.msra.mxu1 %v6315_v45 }
 0x1e3   :  { %5586 = vmatprep.subr.bf16.mxu1 %v6316_v47 }
 0x1e6   :  { %5587 = vmatpush3.bf16.msra.mxu1 %v6320_v48  ;;  %v6369_v48 = vld [vmem:[#allocation10 + $0x37c] ss:$12 sps:$4 sm:$0xff]  }
 0x1e7   :  { %5588 = vmatprep.subr.bf16.mxu1 %v6321_v50 }
 0x1ea   :  { %5589 = vmatpush3.bf16.msra.mxu1 %v6325_v51 }
 0x1eb   :  { %5590 = vmatprep.subr.bf16.mxu1 %v6326_v20  ;;  %v6370_v20 = vld [vmem:[#allocation10 + $0x1e8] ss:$12 sps:$4 sm:$0xff]  }
 0x1ee   :  { %5591 = vmatpush3.bf16.msra.mxu1 %v6330_v56 }
 0x1ef   :  { %5592 = vmatprep.subr.bf16.mxu1 %v6331_v14  ;;  %v6371_v14 = vld [vmem:[#allocation10 + $0x2c0] ss:$12 sps:$4 sm:$0xff]  }
 0x1f0   :  { %v2052_v0 = vpop.f32.mrb[4].mxu1 }
 0x1f1   :  { %v5718_v1 = vadd.f32 %v2052_v0, %v400_v57  ;;  %v2054_v2 = vpop.f32.mrb[5].mxu1 }
 0x1f2   :  { %v5719_v4 = vadd.f32 %v2054_v2, %v404_v59  ;;  %v2056_v5 = vpop.f32.mrb[6].mxu1  ;;  %5593 = vmatpush3.bf16.msra.mxu1 %v6335_v60  ;;  %v6376_v2 = vld [vmem:[#allocation10 + $0x2d8] ss:$12 sps:$4 sm:$0xff]  }
 0x1f3   :  { %v5720_v7 = vadd.f32 %v2056_v5, %v400_v57  ;;  %v2058_v8 = vpop.f32.mrb[7].mxu1  ;;  %5594 = vmatprep.subr.bf16.mxu1 %v6336_v63  ;;  %v2407_v11 = vmax.f32 %v5718_v1, 0.0  ;;  %v6374_v63 = vld [vmem:[#allocation10 + $0x394] ss:$12 sps:$4 sm:$0xff]   ;;  %v6379_v5 = vld [vmem:[#allocation10 + $0x3ac] ss:$12 sps:$4 sm:$0xff]  }
 0x1f4   :  { %v5721_v10 = vadd.f32 %v2058_v8, %v404_v59  ;;  %v2408_v15 = vmax.f32 %v5719_v4, 0.0  ;;  %v6367_v59 = vld [vmem:[#allocation10 + $0x378] ss:$12 sps:$4 sm:$0xff]   ;;  %v6375_v1 = vld [vmem:[#allocation10 + $0x200] ss:$12 sps:$4 sm:$0xff]  }
 0x1f5   :  { %v2419_v12 = vmax.f32 %v5720_v7, 0.0  ;;  %v6372_v4 = vld [vmem:[#allocation10 + $0x390] ss:$12 sps:$4 sm:$0xff]   ;;  %v6377_v8 = vld [vmem:[#allocation10 + $0x3a8] ss:$12 sps:$4 sm:$0xff]  }
 0x1f6   :  { %v2420_v16 = vmax.f32 %v5721_v10, 0.0  ;;  %5595 = vmatpush3.bf16.msra.mxu1 %v6340_v6  ;;  %v6380_v6 = vld [vmem:[#allocation10 + $0x218] ss:$12 sps:$4 sm:$0xff]   ;;  %v6381_v7 = vld [vmem:[#allocation10 + $0x2f0] ss:$12 sps:$4 sm:$0xff]  }
 0x1f7   :  { %v6936_v17 = vpack.c.bf16 %v2419_v12, %v2407_v11  ;;  %5596 = vmatprep.subr.bf16.mxu1 %v6341_v9  ;;  %v2310_v36 = vpop.f32.mrb[4].mxu0  ;;  %v6384_v9 = vld [vmem:[#allocation10 + $0x3c4] ss:$12 sps:$4 sm:$0xff]   ;;  %v6386_v11 = vld [vmem:[#allocation10 + $0x3c8] ss:$12 sps:$4 sm:$0xff]  }
 0x1f8   :  { %v2432_v19 = vpack.c.bf16 %v2420_v16, %v2408_v15  ;;  %v5730_v38 = vadd.f32 %v2310_v36, %v424_v31  ;;  %v2312_v39 = vpop.f32.mrb[5].mxu0  ;;  %v6385_v10 = vld [vmem:[#allocation10 + $0x230] ss:$12 sps:$4 sm:$0xff]   ;;  %v6382_v12 = vld [vmem:[#allocation10 + $0x3c0] ss:$12 sps:$4 sm:$0xff]  }
 0x1f9   :  { %v5731_v41 = vadd.f32 %v2312_v39, %v428_v32  ;;  %v2314_v42 = vpop.f32.mrb[6].mxu0  ;;  %v6389_v15 = vld [vmem:[#allocation10 + $0x3dc] ss:$12 sps:$4 sm:$0xff]  }
 0x1fa   :  { %4453 = vmatprep.mubr.bf16.mxu0 %v2432_v19  ;;  %5597 = vmatpush3.bf16.msra.mxu1 %v6345_v52  ;;  %v2413_v44 = vmax.f32 %v5730_v38, 0.0  ;;  %v5732_v45 = vadd.f32 %v2314_v42, %v424_v31  ;;  %v2316_v47 = vpop.f32.mrb[7].mxu0  ;;  %v6390_v16 = vld [vmem:[#allocation10 + $0x308] ss:$12 sps:$4 sm:$0xff]   ;;  %v6391_v52 = vld [vmem:[#allocation10 + $0x3e0] ss:$12 sps:$4 sm:$0xff]  }
 0x1fb   :  { %4454 = vmatmul.mubr.bf16.vlgmr.msra.gmra.mrb[8].mxu0 %v6936_v17  ;;  %5604 = vmatprep.subr.bf16.mxu1 %v6346_v18  ;;  %v2414_v50 = vmax.f32 %v5731_v41, 0.0  ;;  %v5733_v51 = vadd.f32 %v2316_v47, %v428_v32  ;;  %v6387_v18 = vld [vmem:[#allocation10 + $0x3d8] ss:$12 sps:$4 sm:$0xff]   ;;  %v6411_v31 = vld [vmem:[#allocation10 + $0x440] ss:$12 sps:$4 sm:$0xff]  }
 0x1fc   :  { %4465 = vmatpush1.bf16.msra.mxu0 %v6342_v21  ;;  %4496 = vmatprep.mubr.bf16.mxu0 %v6921_v62  ;;  %v2425_v56 = vmax.f32 %v5732_v45, 0.0  ;;  %v6395_v21 = vld [vmem:[#allocation10 + $0x320] ss:$12 sps:$4 sm:$0xff]   ;;  %v6412_v36 = vld [vmem:[#allocation10 + $0x450] ss:$12 sps:$4 sm:$0xff]  }
 0x1fd   :  { %4669 = vmatmul.mubr.bf16.vlgmr.msra.gmra.mrb[16].mxu1 %v6909_v13  ;;  %4466 = vmatprep.subr.bf16.mxu0 %v6349_v22  ;;  %v6361_v13 = vld [vmem:[#allocation10 + $0x290] ss:$12 sps:$4 sm:$0xff]   ;;  %v2426_v57 = vmax.f32 %v5733_v51, 0.0  ;;  %v6396_v22 = vld [vmem:[#allocation10 + $0x3f8] ss:$12 sps:$4 sm:$0xff]  }
 0x1fe   :  { %5605 = vmatpush3.bf16.msra.mxu1 %v6350_v23  ;;  %4709 = vmatprep.mubr.bf16.mxu1 %v2432_v19  ;;  %v6947_v60 = vpack.c.bf16 %v2425_v56, %v2413_v44  ;;  %v6394_v19 = vld [vmem:[#allocation10 + $0x3f4] ss:$12 sps:$4 sm:$0xff]   ;;  %v6392_v23 = vld [vmem:[#allocation10 + $0x3f0] ss:$12 sps:$4 sm:$0xff]   ;;  %v6420_v38 = vld [vmem:[#allocation10 + $0x398] ss:$12 sps:$4 sm:$0xff]  }
 0x1ff   :  { %5606 = vmatprep.subr.bf16.mxu1 %v6351_v24  ;;  %v6949_v0 = vpack.c.bf16 %v2426_v57, %v2414_v50  ;;  %v6399_v24 = vld [vmem:[#allocation10 + $0x40c] ss:$12 sps:$4 sm:$0xff]   ;;  %v6414_v32 = vld [vmem:[#allocation10 + $0x454] ss:$12 sps:$4 sm:$0xff]   ;;  %v6421_v39 = vld [vmem:[#allocation10 + $0x470] ss:$12 sps:$4 sm:$0xff]  }
 0x200   :  { %4467 = vmatpush1.bf16.msra.mxu0 %v6347_v25  ;;  %v6400_v25 = vld [vmem:[#allocation10 + $0x338] ss:$12 sps:$4 sm:$0xff]   ;;  %v6425_v42 = vld [vmem:[#allocation10 + $0x3b0] ss:$12 sps:$4 sm:$0xff]   ;;  %v6422_v44 = vld [vmem:[#allocation10 + $0x480] ss:$12 sps:$4 sm:$0xff]  }
 0x201   :  { %4468 = vmatprep.subr.bf16.mxu0 %v6354_v61  ;;  %v6401_v61 = vld [vmem:[#allocation10 + $0x410] ss:$12 sps:$4 sm:$0xff]   ;;  %v6430_v47 = vld [vmem:[#allocation10 + $0x488] ss:$12 sps:$4 sm:$0xff]   ;;  %v6427_v50 = vld [vmem:[#allocation10 + $0x498] ss:$12 sps:$4 sm:$0xff]  }
 0x202   :  { %5607 = vmatpush3.bf16.msra.mxu1 %v6355_v26  ;;  %v6397_v26 = vld [vmem:[#allocation10 + $0x408] ss:$12 sps:$4 sm:$0xff]   ;;  %v6424_v41 = vld [vmem:[#allocation10 + $0x484] ss:$12 sps:$4 sm:$0xff]   ;;  %v6439_v57 = vld [vmem:[#allocation10 + $0x4cc] ss:$12 sps:$4 sm:$0xff]  }
 0x203   :  { %5608 = vmatprep.subr.bf16.mxu1 %v6356_v27  ;;  %v6405_v27 = vld [vmem:[#allocation10 + $0x350] ss:$12 sps:$4 sm:$0xff]   ;;  %v6434_v51 = vld [vmem:[#allocation10 + $0x4b4] ss:$12 sps:$4 sm:$0xff]   ;;  %v6436_v56 = vld [vmem:[#allocation10 + $0x578] ss:$12 sps:$4 sm:$0xff]  }
 0x204   :  { %4469 = vmatpush1.bf16.msra.mxu0 %v6352_v28  ;;  %v6406_v28 = vld [vmem:[#allocation10 + $0x428] ss:$12 sps:$4 sm:$0xff]  }
 0x205   :  { %4470 = vmatprep.subr.bf16.mxu0 %v6359_v29  ;;  %v6409_v29 = vld [vmem:[#allocation10 + $0x43c] ss:$12 sps:$4 sm:$0xff]  }
 0x206   :  { %5609 = vmatpush3.bf16.msra.mxu1 %v6360_v30  ;;  %v6410_v30 = vld [vmem:[#allocation10 + $0x368] ss:$12 sps:$4 sm:$0xff]  }
 0x207   :  { %5610 = vmatprep.subr.bf16.mxu1 %v6361_v13  ;;  %v6407_v13 = vld [vmem:[#allocation10 + $0x438] ss:$12 sps:$4 sm:$0xff]   ;;  %v6429_v45 = vld [vmem:[#allocation10 + $0x49c] ss:$12 sps:$4 sm:$0xff]  }
 0x208   :  { %4471 = vmatpush1.bf16.msra.mxu0 %v6357_v33  ;;  %v6415_v33 = vld [vmem:[#allocation10 + $0x380] ss:$12 sps:$4 sm:$0xff]  }
 0x209   :  { %4472 = vmatprep.subr.bf16.mxu0 %v6364_v35  ;;  %v6416_v35 = vld [vmem:[#allocation10 + $0x458] ss:$12 sps:$4 sm:$0xff]  }
 0x20a   :  { %5611 = vmatpush3.bf16.msra.mxu1 %v6365_v37  ;;  %v6419_v37 = vld [vmem:[#allocation10 + $0x46c] ss:$12 sps:$4 sm:$0xff]  }
 0x20b   :  { %5612 = vmatprep.subr.bf16.mxu1 %v6366_v40  ;;  %v6417_v40 = vld [vmem:[#allocation10 + $0x468] ss:$12 sps:$4 sm:$0xff]  }
 0x20c   :  { %4473 = vmatpush1.bf16.msra.mxu0 %v6362_v43  ;;  %v6426_v43 = vld [vmem:[#allocation10 + $0x548] ss:$12 sps:$4 sm:$0xff]  }
 0x20d   :  { %4474 = vmatprep.subr.bf16.mxu0 %v6369_v48  ;;  %v6431_v48 = vld [vmem:[#allocation10 + $0x560] ss:$12 sps:$4 sm:$0xff]  }
 0x20e   :  { %5613 = vmatpush3.bf16.msra.mxu1 %v6370_v20  ;;  %v6435_v20 = vld [vmem:[#allocation10 + $0x4a0] ss:$12 sps:$4 sm:$0xff]  }
 0x20f   :  { %5614 = vmatprep.subr.bf16.mxu1 %v6371_v14  ;;  %v6432_v14 = vld [vmem:[#allocation10 + $0x4b0] ss:$12 sps:$4 sm:$0xff]  }
 0x210   :  { %4475 = vmatpush1.bf16.msra.mxu0 %v6367_v59  ;;  %v6440_v59 = vld [vmem:[#allocation10 + $0x4b8] ss:$12 sps:$4 sm:$0xff]  }
 0x211   :  { %4476 = vmatprep.subr.bf16.mxu0 %v6374_v63  ;;  %v6441_v63 = vld [vmem:[#allocation10 + $0x590] ss:$12 sps:$4 sm:$0xff]  }
 0x212   :  { %5615 = vmatpush3.bf16.msra.mxu1 %v6375_v1  ;;  %v6437_v1 = vld [vmem:[#allocation10 + $0x4c8] ss:$12 sps:$4 sm:$0xff]  }
 0x213   :  { %5616 = vmatprep.subr.bf16.mxu1 %v6376_v2  ;;  %v6444_v2 = vld [vmem:[#allocation10 + $0x4e4] ss:$12 sps:$4 sm:$0xff]  }
 0x214   :  { %4477 = vmatpush1.bf16.msra.mxu0 %v6372_v4  ;;  %v6446_v4 = vld [vmem:[#allocation10 + $0x5a8] ss:$12 sps:$4 sm:$0xff]  }
 0x215   :  { %4478 = vmatprep.subr.bf16.mxu0 %v6379_v5  ;;  %v6442_v5 = vld [vmem:[#allocation10 + $0x4e0] ss:$12 sps:$4 sm:$0xff]  }
 0x216   :  { %5617 = vmatpush3.bf16.msra.mxu1 %v6380_v6  ;;  %v6449_v6 = vld [vmem:[#allocation10 + $0x4fc] ss:$12 sps:$4 sm:$0xff]  }
 0x217   :  { %5618 = vmatprep.subr.bf16.mxu1 %v6381_v7  ;;  %v415_v7 = vsub.s32 6, %v6895_v49 }
 0x218   :  { %4479 = vmatpush1.bf16.msra.mxu0 %v6377_v8  ;;  %v6450_v8 = vld [vmem:[#allocation10 + $0x4e8] ss:$12 sps:$4 sm:$0xff]  }
 0x219   :  { %4480 = vmatprep.subr.bf16.mxu0 %v6384_v9  ;;  %v419_v9 = vsub.s32 7, %v6895_v49 }
 0x21a   :  { %5619 = vmatpush3.bf16.msra.mxu1 %v6385_v10  ;;  %v6451_v10 = vld [vmem:[#allocation10 + $0x5c0] ss:$12 sps:$4 sm:$0xff]  }
 0x21b   :  { %5626 = vmatprep.subr.bf16.mxu1 %v6386_v11  ;;  %v6447_v11 = vld [vmem:[#allocation10 + $0x4f8] ss:$12 sps:$4 sm:$0xff]  }
 0x21c   :  { %4481 = vmatpush1.bf16.msra.mxu0 %v6382_v12  ;;  %v6615_v12 = vld [vmem:[#allocation9] sm:$0xff] }
 0x21d   :  { %4710 = vmatmul.mubr.bf16.vlgmr.msra.gmra.mrb[20].mxu1 %v6936_v17  ;;  %4482 = vmatprep.subr.bf16.mxu0 %v6389_v15  ;;  %v6404_v17 = vld [vmem:[#allocation10 + $0x424] ss:$12 sps:$4 sm:$0xff]   ;;  %v416_v15 = vrot.slane %v6615_v12, %v415_v7  ;;  %v6495_v7 = vld [vmem:[#allocation10 + $0x680] ss:$12 sps:$4 sm:$0xff]  }
 0x21e   :  { %5627 = vmatpush3.bf16.msra.mxu1 %v6390_v16  ;;  %4750 = vmatprep.mubr.bf16.mxu1 %v6921_v62  ;;  %v6402_v62 = vld [vmem:[#allocation10 + $0x420] ss:$12 sps:$4 sm:$0xff]  }
 0x21f   :  { %5628 = vmatprep.subr.bf16.mxu1 %v6391_v52  ;;  %v6454_v16 = vld [vmem:[#allocation10 + $0x514] ss:$12 sps:$4 sm:$0xff]   ;;  %v420_v52 = vrot.slane %v6615_v12, %v419_v9  ;;  %v6492_v9 = vld [vmem:[#allocation10 + $0x5d0] ss:$12 sps:$4 sm:$0xff]  }
 0x220   :  { %4483 = vmatpush1.bf16.msra.mxu0 %v6387_v18  ;;  %v6455_v18 = vld [vmem:[#allocation10 + $0x500] ss:$12 sps:$4 sm:$0xff]   ;;  %v6501_v12 = vld [vmem:[#allocation10 + $0x770] ss:$12 sps:$4 sm:$0xff]  }
 0x221   :  { %4484 = vmatprep.subr.bf16.mxu0 %v6394_v19  ;;  %v6456_v19 = vld [vmem:[#allocation10 + $0x5d8] ss:$12 sps:$4 sm:$0xff]  }
 0x222   :  { %5629 = vmatpush3.bf16.msra.mxu1 %v6395_v21 }
 0x223   :  { %5630 = vmatprep.subr.bf16.mxu1 %v6396_v22  ;;  %v6452_v22 = vld [vmem:[#allocation10 + $0x510] ss:$12 sps:$4 sm:$0xff]  }
 0x224   :  { %4485 = vmatpush1.bf16.msra.mxu0 %v6392_v23 }
 0x225   :  { %4486 = vmatprep.subr.bf16.mxu0 %v6399_v24 }
 0x226   :  { %5631 = vmatpush3.bf16.msra.mxu1 %v6400_v25  ;;  %v6459_v25 = vld [vmem:[#allocation10 + $0x52c] ss:$12 sps:$4 sm:$0xff]  }
 0x227   :  { %5632 = vmatprep.subr.bf16.mxu1 %v6401_v61 }
 0x228   :  { %4487 = vmatpush1.bf16.msra.mxu0 %v6397_v26 }
 0x229   :  { %4488 = vmatprep.subr.bf16.mxu0 %v6404_v17  ;;  %v6460_v17 = vld [vmem:[#allocation10 + $0x518] ss:$12 sps:$4 sm:$0xff]  }
 0x22a   :  { %5633 = vmatpush3.bf16.msra.mxu1 %v6405_v27 }
 0x22b   :  { %5634 = vmatprep.subr.bf16.mxu1 %v6406_v28 }
 0x22c   :  { %4489 = vmatpush1.bf16.msra.mxu0 %v6402_v62 }
 0x22d   :  { %4490 = vmatprep.subr.bf16.mxu0 %v6409_v29  ;;  %v6461_v29 = vld [vmem:[#allocation10 + $0x5f0] ss:$12 sps:$4 sm:$0xff]  }
 0x22e   :  { %5635 = vmatpush3.bf16.msra.mxu1 %v6410_v30 }
 0x22f   :  { %5636 = vmatprep.subr.bf16.mxu1 %v6411_v31  ;;  %v6457_v31 = vld [vmem:[#allocation10 + $0x528] ss:$12 sps:$4 sm:$0xff]  }
 0x230   :  { %4491 = vmatpush1.bf16.msra.mxu0 %v6407_v13 }
 0x231   :  { %4492 = vmatprep.subr.bf16.mxu0 %v6414_v32  ;;  %v6464_v32 = vld [vmem:[#allocation10 + $0x544] ss:$12 sps:$4 sm:$0xff]  }
 0x232   :  { %5637 = vmatpush3.bf16.msra.mxu1 %v6415_v33 }
 0x233   :  { %5638 = vmatprep.subr.bf16.mxu1 %v6416_v35 }
 0x234   :  { %4493 = vmatpush1.bf16.msra.mxu0 %v6412_v36  ;;  %v6465_v36 = vld [vmem:[#allocation10 + $0x530] ss:$12 sps:$4 sm:$0xff]  }
 0x235   :  { %4494 = vmatprep.subr.bf16.mxu0 %v6419_v37 }
 0x236   :  { %5639 = vmatpush3.bf16.msra.mxu1 %v6420_v38  ;;  %v6466_v38 = vld [vmem:[#allocation10 + $0x6c8] ss:$12 sps:$4 sm:$0xff]  }
 0x237   :  { %5640 = vmatprep.subr.bf16.mxu1 %v6421_v39 }
 0x238   :  { %4495 = vmatpush1.bf16.msra.mxu0 %v6417_v40  ;;  %v6462_v40 = vld [vmem:[#allocation10 + $0x540] ss:$12 sps:$4 sm:$0xff]  }
 0x239   :  { %4507 = vmatprep.subr.bf16.mxu0 %v6424_v41  ;;  %v6469_v41 = vld [vmem:[#allocation10 + $0x55c] ss:$12 sps:$4 sm:$0xff]  }
 0x23a   :  { %5641 = vmatpush3.bf16.msra.mxu1 %v6425_v42  ;;  %v6470_v42 = vld [vmem:[#allocation10 + $0x608] ss:$12 sps:$4 sm:$0xff]  }
 0x23b   :  { %4497 = vmatmul.mubr.bf16.vlgmr.msra.gmra.mrb[8].mxu0 %v6919_v58  ;;  %5648 = vmatprep.subr.bf16.mxu1 %v6426_v43  ;;  %v6471_v43 = vld [vmem:[#allocation10 + $0x6e0] ss:$12 sps:$4 sm:$0xff]  }
 0x23c   :  { %4508 = vmatpush1.bf16.msra.mxu0 %v6422_v44  ;;  %v6467_v44 = vld [vmem:[#allocation10 + $0x558] ss:$12 sps:$4 sm:$0xff]  }
 0x23d   :  { %4751 = vmatmul.mubr.bf16.vlgmr.msra.gmra.mrb[24].mxu1 %v6919_v58  ;;  %4509 = vmatprep.subr.bf16.mxu0 %v6429_v45  ;;  %v6445_v58 = vld [vmem:[#allocation10 + $0x4d0] ss:$12 sps:$4 sm:$0xff]   ;;  %v6474_v45 = vld [vmem:[#allocation10 + $0x574] ss:$12 sps:$4 sm:$0xff]  }
 0x23e   :  { %5649 = vmatpush3.bf16.msra.mxu1 %v6430_v47  ;;  %v6475_v47 = vld [vmem:[#allocation10 + $0x620] ss:$12 sps:$4 sm:$0xff]  }
 0x23f   :  { %5650 = vmatprep.subr.bf16.mxu1 %v6431_v48  ;;  %v6476_v48 = vld [vmem:[#allocation10 + $0x6f8] ss:$12 sps:$4 sm:$0xff]  }
 0x240   :  { %4510 = vmatpush1.bf16.msra.mxu0 %v6427_v50  ;;  %v6472_v50 = vld [vmem:[#allocation10 + $0x570] ss:$12 sps:$4 sm:$0xff]  }
 0x241   :  { %4511 = vmatprep.subr.bf16.mxu0 %v6434_v51  ;;  %v6479_v51 = vld [vmem:[#allocation10 + $0x58c] ss:$12 sps:$4 sm:$0xff]  }
 0x242   :  { %5651 = vmatpush3.bf16.msra.mxu1 %v6435_v20  ;;  %v6480_v20 = vld [vmem:[#allocation10 + $0x638] ss:$12 sps:$4 sm:$0xff]  }
 0x243   :  { %5652 = vmatprep.subr.bf16.mxu1 %v6436_v56  ;;  %v6481_v56 = vld [vmem:[#allocation10 + $0x710] ss:$12 sps:$4 sm:$0xff]  }
 0x244   :  { %4512 = vmatpush1.bf16.msra.mxu0 %v6432_v14  ;;  %v6477_v14 = vld [vmem:[#allocation10 + $0x588] ss:$12 sps:$4 sm:$0xff]  }
 0x245   :  { %4513 = vmatprep.subr.bf16.mxu0 %v6439_v57  ;;  %v6484_v57 = vld [vmem:[#allocation10 + $0x5a4] ss:$12 sps:$4 sm:$0xff]  }
 0x246   :  { %5653 = vmatpush3.bf16.msra.mxu1 %v6440_v59  ;;  %v6485_v59 = vld [vmem:[#allocation10 + $0x650] ss:$12 sps:$4 sm:$0xff]  }
 0x247   :  { %5654 = vmatprep.subr.bf16.mxu1 %v6441_v63  ;;  %v6486_v63 = vld [vmem:[#allocation10 + $0x728] ss:$12 sps:$4 sm:$0xff]  }
 0x248   :  { %4514 = vmatpush1.bf16.msra.mxu0 %v6437_v1  ;;  %v6482_v1 = vld [vmem:[#allocation10 + $0x5a0] ss:$12 sps:$4 sm:$0xff]  }
 0x249   :  { %4515 = vmatprep.subr.bf16.mxu0 %v6444_v2  ;;  %v6489_v2 = vld [vmem:[#allocation10 + $0x5bc] ss:$12 sps:$4 sm:$0xff]  }
 0x24a   :  { %5655 = vmatpush3.bf16.msra.mxu1 %v6445_v58  ;;  %v6490_v58 = vld [vmem:[#allocation10 + $0x668] ss:$12 sps:$4 sm:$0xff]  }
 0x24b   :  { %5656 = vmatprep.subr.bf16.mxu1 %v6446_v4  ;;  %v6491_v4 = vld [vmem:[#allocation10 + $0x740] ss:$12 sps:$4 sm:$0xff]  }
 0x24c   :  { %4516 = vmatpush1.bf16.msra.mxu0 %v6442_v5  ;;  %v6487_v5 = vld [vmem:[#allocation10 + $0x5b8] ss:$12 sps:$4 sm:$0xff]  }
 0x24d   :  { %4517 = vmatprep.subr.bf16.mxu0 %v6449_v6  ;;  %v6494_v6 = vld [vmem:[#allocation10 + $0x5d4] ss:$12 sps:$4 sm:$0xff]  }
 0x24e   :  { %5657 = vmatpush3.bf16.msra.mxu1 %v6450_v8  ;;  %v6496_v8 = vld [vmem:[#allocation10 + $0x758] ss:$12 sps:$4 sm:$0xff]  }
 0x24f   :  { %5658 = vmatprep.subr.bf16.mxu1 %v6451_v10  ;;  %v6499_v10 = vld [vmem:[#allocation10 + $0x5ec] ss:$12 sps:$4 sm:$0xff]  }
 0x250   :  { %4518 = vmatpush1.bf16.msra.mxu0 %v6447_v11  ;;  %v2224_v21 = vpop.f32.mrb[8].mxu1  ;;  %v6500_v11 = vld [vmem:[#allocation10 + $0x698] ss:$12 sps:$4 sm:$0xff]  }
 0x251   :  { %v5726_v23 = vadd.f32 %v2224_v21, %v416_v15  ;;  %v2226_v24 = vpop.f32.mrb[9].mxu1  ;;  %4519 = vmatprep.subr.bf16.mxu0 %v6454_v16  ;;  %v6504_v16 = vld [vmem:[#allocation10 + $0x604] ss:$12 sps:$4 sm:$0xff]   ;;  %v6508_v21 = vld [vmem:[#allocation10 + $0x61c] ss:$12 sps:$4 sm:$0xff]  }
 0x252   :  { %v5727_v61 = vadd.f32 %v2226_v24, %v420_v52  ;;  %v2228_v26 = vpop.f32.mrb[10].mxu1  ;;  %5659 = vmatpush3.bf16.msra.mxu1 %v6455_v18  ;;  %v6530_v18 = vld [vmem:[#allocation10 + $0x848] ss:$12 sps:$4 sm:$0xff]   ;;  %v6506_v24 = vld [vmem:[#allocation10 + $0x618] ss:$12 sps:$4 sm:$0xff]  }
 0x253   :  { %v2411_v27 = vmax.f32 %v5726_v23, 0.0  ;;  %v5728_v28 = vadd.f32 %v2228_v26, %v416_v15  ;;  %v2230_v62 = vpop.f32.mrb[11].mxu1  ;;  %5660 = vmatprep.subr.bf16.mxu1 %v6456_v19  ;;  %v6497_v15 = vld [vmem:[#allocation10 + $0x5e8] ss:$12 sps:$4 sm:$0xff]   ;;  %v6502_v19 = vld [vmem:[#allocation10 + $0x600] ss:$12 sps:$4 sm:$0xff]  }
 0x254   :  { %v5729_v30 = vadd.f32 %v2230_v62, %v420_v52  ;;  %4520 = vmatpush1.bf16.msra.mxu0 %v6452_v22  ;;  %v2412_v33 = vmax.f32 %v5727_v61, 0.0  ;;  %v6505_v52 = vld [vmem:[#allocation10 + $0x6b0] ss:$12 sps:$4 sm:$0xff]   ;;  %v6531_v22 = vld [vmem:[#allocation10 + $0x788] ss:$12 sps:$4 sm:$0xff]  }
 0x255   :  { %v2423_v13 = vmax.f32 %v5728_v28, 0.0  ;;  %4521 = vmatprep.subr.bf16.mxu0 %v6459_v25  ;;  %v6535_v23 = vld [vmem:[#allocation10 + $0x860] ss:$12 sps:$4 sm:$0xff]   ;;  %v6540_v26 = vld [vmem:[#allocation10 + $0x878] ss:$12 sps:$4 sm:$0xff]  }
 0x256   :  { %v2424_v35 = vmax.f32 %v5729_v30, 0.0  ;;  %5661 = vmatpush3.bf16.msra.mxu1 %v6460_v17  ;;  %v6511_v25 = vld [vmem:[#allocation10 + $0x634] ss:$12 sps:$4 sm:$0xff]   ;;  %v6509_v17 = vld [vmem:[#allocation10 + $0x630] ss:$12 sps:$4 sm:$0xff]  }
 0x257   :  { %v6957_v37 = vpack.c.bf16 %v2423_v13, %v2411_v27  ;;  %5662 = vmatprep.subr.bf16.mxu1 %v6461_v29  ;;  %v6536_v61 = vld [vmem:[#allocation10 + $0x7a0] ss:$12 sps:$4 sm:$0xff]   ;;  %v6541_v28 = vld [vmem:[#allocation10 + $0x7b8] ss:$12 sps:$4 sm:$0xff]   ;;  %v6545_v62 = vld [vmem:[#allocation10 + $0x890] ss:$12 sps:$4 sm:$0xff]  }
 0x258   :  { %v2436_v39 = vpack.c.bf16 %v2424_v35, %v2412_v33  ;;  %4522 = vmatpush1.bf16.msra.mxu0 %v6457_v31  ;;  %v6514_v27 = vld [vmem:[#allocation10 + $0x64c] ss:$12 sps:$4 sm:$0xff]   ;;  %v6512_v29 = vld [vmem:[#allocation10 + $0x648] ss:$12 sps:$4 sm:$0xff]   ;;  %v6546_v30 = vld [vmem:[#allocation10 + $0x7d0] ss:$12 sps:$4 sm:$0xff]  }
 0x259   :  { %4523 = vmatprep.subr.bf16.mxu0 %v6464_v32  ;;  %v6550_v31 = vld [vmem:[#allocation10 + $0x8a8] ss:$12 sps:$4 sm:$0xff]   ;;  %v6515_v13 = vld [vmem:[#allocation10 + $0x660] ss:$12 sps:$4 sm:$0xff]  }
 0x25a   :  { %4539 = vmatprep.mubr.bf16.mxu0 %v2436_v39  ;;  %5663 = vmatpush3.bf16.msra.mxu1 %v6465_v36  ;;  %v6520_v32 = vld [vmem:[#allocation10 + $0x67c] ss:$12 sps:$4 sm:$0xff]   ;;  %v6555_v35 = vld [vmem:[#allocation10 + $0x8c0] ss:$12 sps:$4 sm:$0xff]   ;;  %v6518_v36 = vld [vmem:[#allocation10 + $0x678] ss:$12 sps:$4 sm:$0xff]  }
 0x25b   :  { %4791 = vmatprep.mubr.bf16.mxu1 %v2436_v39  ;;  %5670 = vmatprep.subr.bf16.mxu1 %v6466_v38  ;;  %v6551_v33 = vld [vmem:[#allocation10 + $0x7e8] ss:$12 sps:$4 sm:$0xff]   ;;  %v6556_v38 = vld [vmem:[#allocation10 + $0x800] ss:$12 sps:$4 sm:$0xff]   ;;  %v6560_v39 = vld [vmem:[#allocation10 + $0x8d8] ss:$12 sps:$4 sm:$0xff]  }
 0x25c   :  { %4524 = vmatpush1.bf16.msra.mxu0 %v6462_v40  ;;  %v6521_v40 = vld [vmem:[#allocation10 + $0x690] ss:$12 sps:$4 sm:$0xff]  }
 0x25d   :  { %4792 = vmatmul.mubr.bf16.vlgmr.msra.gmra.mrb[28].mxu1 %v6957_v37  ;;  %4525 = vmatprep.subr.bf16.mxu0 %v6469_v41  ;;  %v6526_v41 = vld [vmem:[#allocation10 + $0x6ac] ss:$12 sps:$4 sm:$0xff]  }
 0x25e   :  { %5671 = vmatpush3.bf16.msra.mxu1 %v6470_v42  ;;  %4832 = vmatprep.mubr.bf16.mxu1 %v6949_v0  ;;  %v6561_v42 = vld [vmem:[#allocation10 + $0x818] ss:$12 sps:$4 sm:$0xff]  }
 0x25f   :  { %5672 = vmatprep.subr.bf16.mxu1 %v6471_v43  ;;  %v6565_v43 = vld [vmem:[#allocation10 + $0x8f0] ss:$12 sps:$4 sm:$0xff]  }
 0x260   :  { %4526 = vmatpush1.bf16.msra.mxu0 %v6467_v44  ;;  %v6524_v44 = vld [vmem:[#allocation10 + $0x6a8] ss:$12 sps:$4 sm:$0xff]  }
 0x261   :  { %4527 = vmatprep.subr.bf16.mxu0 %v6474_v45  ;;  %v6529_v45 = vld [vmem:[#allocation10 + $0x6c4] ss:$12 sps:$4 sm:$0xff]  }
 0x262   :  { %5673 = vmatpush3.bf16.msra.mxu1 %v6475_v47  ;;  %v6566_v47 = vld [vmem:[#allocation10 + $0x830] ss:$12 sps:$4 sm:$0xff]  }
 0x263   :  { %5674 = vmatprep.subr.bf16.mxu1 %v6476_v48  ;;  %v6527_v48 = vld [vmem:[#allocation10 + $0x6c0] ss:$12 sps:$4 sm:$0xff]  }
 0x264   :  { %4528 = vmatpush1.bf16.msra.mxu0 %v6472_v50  ;;  %v6534_v50 = vld [vmem:[#allocation10 + $0x6dc] ss:$12 sps:$4 sm:$0xff]  }
 0x265   :  { %4529 = vmatprep.subr.bf16.mxu0 %v6479_v51  ;;  %v6532_v51 = vld [vmem:[#allocation10 + $0x6d8] ss:$12 sps:$4 sm:$0xff]  }
 0x266   :  { %5675 = vmatpush3.bf16.msra.mxu1 %v6480_v20  ;;  %v6539_v20 = vld [vmem:[#allocation10 + $0x6f4] ss:$12 sps:$4 sm:$0xff]  }
 0x267   :  { %5676 = vmatprep.subr.bf16.mxu1 %v6481_v56  ;;  %v6537_v56 = vld [vmem:[#allocation10 + $0x6f0] ss:$12 sps:$4 sm:$0xff]  }
 0x268   :  { %4530 = vmatpush1.bf16.msra.mxu0 %v6477_v14  ;;  %v6544_v14 = vld [vmem:[#allocation10 + $0x70c] ss:$12 sps:$4 sm:$0xff]  }
 0x269   :  { %4531 = vmatprep.subr.bf16.mxu0 %v6484_v57  ;;  %v6542_v57 = vld [vmem:[#allocation10 + $0x708] ss:$12 sps:$4 sm:$0xff]  }
 0x26a   :  { %5677 = vmatpush3.bf16.msra.mxu1 %v6485_v59  ;;  %v6549_v59 = vld [vmem:[#allocation10 + $0x724] ss:$12 sps:$4 sm:$0xff]  }
 0x26b   :  { %5678 = vmatprep.subr.bf16.mxu1 %v6486_v63  ;;  %v6547_v63 = vld [vmem:[#allocation10 + $0x720] ss:$12 sps:$4 sm:$0xff]  }
 0x26c   :  { %4532 = vmatpush1.bf16.msra.mxu0 %v6482_v1  ;;  %v6554_v1 = vld [vmem:[#allocation10 + $0x73c] ss:$12 sps:$4 sm:$0xff]  }
 0x26d   :  { %4533 = vmatprep.subr.bf16.mxu0 %v6489_v2  ;;  %v6552_v2 = vld [vmem:[#allocation10 + $0x738] ss:$12 sps:$4 sm:$0xff]  }
 0x26e   :  { %5679 = vmatpush3.bf16.msra.mxu1 %v6490_v58  ;;  %v432_v58 = vrot.slane %v6941_v3, %v6928_v55 }
 0x26f   :  { %5680 = vmatprep.subr.bf16.mxu1 %v6491_v4  ;;  %v6559_v4 = vld [vmem:[#allocation10 + $0x754] ss:$12 sps:$4 sm:$0xff]  }
 0x270   :  { %4534 = vmatpush1.bf16.msra.mxu0 %v6487_v5  ;;  %v436_v5 = vrot.slane %v6941_v3, %v403_v34 }
 0x271   :  { %4535 = vmatprep.subr.bf16.mxu0 %v6494_v6 }
 0x272   :  { %5681 = vmatpush3.bf16.msra.mxu1 %v6495_v7  ;;  %v6557_v7 = vld [vmem:[#allocation10 + $0x750] ss:$12 sps:$4 sm:$0xff]  }
 0x273   :  { %5682 = vmatprep.subr.bf16.mxu1 %v6496_v8 }
 0x274   :  { %4536 = vmatpush1.bf16.msra.mxu0 %v6492_v9 }
 0x275   :  { %4537 = vmatprep.subr.bf16.mxu0 %v6499_v10  ;;  %v6564_v10 = vld [vmem:[#allocation10 + $0x76c] ss:$12 sps:$4 sm:$0xff]  }
 0x276   :  { %5683 = vmatpush3.bf16.msra.mxu1 %v6500_v11 }
 0x277   :  { %5684 = vmatprep.subr.bf16.mxu1 %v6501_v12 }
 0x278   :  { %4538 = vmatpush1.bf16.msra.mxu0 %v6497_v15 }
 0x279   :  { %4550 = vmatprep.subr.bf16.mxu0 %v6504_v16 }
 0x27a   :  { %5685 = vmatpush3.bf16.msra.mxu1 %v6505_v52 }
 0x27b   :  { %4540 = vmatmul.mubr.bf16.vlgmr.msra.gmra.mrb[8].mxu0 %v6957_v37  ;;  %5692 = vmatprep.subr.bf16.mxu1 %v6530_v18  ;;  %v6523_v37 = vld [vmem:[#allocation10 + $0x694] ss:$12 sps:$4 sm:$0xff]  }
 0x27c   :  { %4551 = vmatpush1.bf16.msra.mxu0 %v6502_v19  ;;  %4582 = vmatprep.mubr.bf16.mxu0 %v6949_v0  ;;  %v6517_v0 = vld [vmem:[#allocation10 + $0x664] ss:$12 sps:$4 sm:$0xff]  }
 0x27d   :  { %4833 = vmatmul.mubr.bf16.vlgmr.msra.gmra.mrb[32].mxu1 %v6947_v60  ;;  %4552 = vmatprep.subr.bf16.mxu0 %v6508_v21  ;;  %v6562_v21 = vld [vmem:[#allocation10 + $0x768] ss:$12 sps:$4 sm:$0xff]  }
 0x27e   :  { %5693 = vmatpush3.bf16.msra.mxu1 %v6531_v22 }
 0x27f   :  { %5694 = vmatprep.subr.bf16.mxu1 %v6535_v23  ;;  %v6569_v23 = vld [vmem:[#allocation10 + $0x784] ss:$12 sps:$4 sm:$0xff]  }
 0x280   :  { %4553 = vmatpush1.bf16.msra.mxu0 %v6506_v24 }
 0x281   :  { %4554 = vmatprep.subr.bf16.mxu0 %v6511_v25  ;;  %v6567_v25 = vld [vmem:[#allocation10 + $0x780] ss:$12 sps:$4 sm:$0xff]  }
 0x282   :  { %5695 = vmatpush3.bf16.msra.mxu1 %v6536_v61  ;;  %v6572_v61 = vld [vmem:[#allocation10 + $0x79c] ss:$12 sps:$4 sm:$0xff]  }
 0x283   :  { %5696 = vmatprep.subr.bf16.mxu1 %v6540_v26  ;;  %v6570_v26 = vld [vmem:[#allocation10 + $0x798] ss:$12 sps:$4 sm:$0xff]  }
 0x284   :  { %4555 = vmatpush1.bf16.msra.mxu0 %v6509_v17  ;;  %v6575_v17 = vld [vmem:[#allocation10 + $0x7b4] ss:$12 sps:$4 sm:$0xff]  }
 0x285   :  { %4556 = vmatprep.subr.bf16.mxu0 %v6514_v27  ;;  %v6573_v27 = vld [vmem:[#allocation10 + $0x7b0] ss:$12 sps:$4 sm:$0xff]  }
 0x286   :  { %5697 = vmatpush3.bf16.msra.mxu1 %v6541_v28  ;;  %v6578_v28 = vld [vmem:[#allocation10 + $0x7cc] ss:$12 sps:$4 sm:$0xff]  }
 0x287   :  { %5698 = vmatprep.subr.bf16.mxu1 %v6545_v62  ;;  %v6576_v62 = vld [vmem:[#allocation10 + $0x7c8] ss:$12 sps:$4 sm:$0xff]  }
 0x288   :  { %4557 = vmatpush1.bf16.msra.mxu0 %v6512_v29  ;;  %v6581_v29 = vld [vmem:[#allocation10 + $0x7e4] ss:$12 sps:$4 sm:$0xff]  }
 0x289   :  { %4558 = vmatprep.subr.bf16.mxu0 %v6517_v0  ;;  %v6579_v0 = vld [vmem:[#allocation10 + $0x7e0] ss:$12 sps:$4 sm:$0xff]  }
 0x28a   :  { %5699 = vmatpush3.bf16.msra.mxu1 %v6546_v30  ;;  %v6584_v30 = vld [vmem:[#allocation10 + $0x7fc] ss:$12 sps:$4 sm:$0xff]  }
 0x28b   :  { %5700 = vmatprep.subr.bf16.mxu1 %v6550_v31  ;;  %v6587_v31 = vld [vmem:[#allocation10 + $0x814] ss:$12 sps:$4 sm:$0xff]  }
 0x28c   :  { %4559 = vmatpush1.bf16.msra.mxu0 %v6515_v13 }
 0x28d   :  { %4560 = vmatprep.subr.bf16.mxu0 %v6520_v32  ;;  %v6585_v32 = vld [vmem:[#allocation10 + $0x810] ss:$12 sps:$4 sm:$0xff]  }
 0x28e   :  { %5701 = vmatpush3.bf16.msra.mxu1 %v6551_v33 }
 0x28f   :  { %5702 = vmatprep.subr.bf16.mxu1 %v6555_v35  ;;  %v6590_v35 = vld [vmem:[#allocation10 + $0x82c] ss:$12 sps:$4 sm:$0xff]  }
 0x290   :  { %4561 = vmatpush1.bf16.msra.mxu0 %v6518_v36 }
 0x291   :  { %4562 = vmatprep.subr.bf16.mxu0 %v6523_v37 }
 0x292   :  { %5703 = vmatpush3.bf16.msra.mxu1 %v6556_v38 }
 0x293   :  { %5704 = vmatprep.subr.bf16.mxu1 %v6560_v39 }
 0x294   :  { %4563 = vmatpush1.bf16.msra.mxu0 %v6521_v40  ;;  %v6588_v40 = vld [vmem:[#allocation10 + $0x828] ss:$12 sps:$4 sm:$0xff]  }
 0x295   :  { %4564 = vmatprep.subr.bf16.mxu0 %v6526_v41  ;;  %v6593_v41 = vld [vmem:[#allocation10 + $0x844] ss:$12 sps:$4 sm:$0xff]  }
 0x296   :  { %5705 = vmatpush3.bf16.msra.mxu1 %v6561_v42  ;;  %v6591_v42 = vld [vmem:[#allocation10 + $0x840] ss:$12 sps:$4 sm:$0xff]  }
 0x297   :  { %5706 = vmatprep.subr.bf16.mxu1 %v6565_v43  ;;  %v6596_v43 = vld [vmem:[#allocation10 + $0x85c] ss:$12 sps:$4 sm:$0xff]  }
 0x298   :  { %4565 = vmatpush1.bf16.msra.mxu0 %v6524_v44  ;;  %v6594_v44 = vld [vmem:[#allocation10 + $0x858] ss:$12 sps:$4 sm:$0xff]  }
 0x299   :  { %4566 = vmatprep.subr.bf16.mxu0 %v6529_v45  ;;  %v6599_v45 = vld [vmem:[#allocation10 + $0x874] ss:$12 sps:$4 sm:$0xff]  }
 0x29a   :  { %5707 = vmatpush3.bf16.msra.mxu1 %v6566_v47  ;;  %v6597_v47 = vld [vmem:[#allocation10 + $0x870] ss:$12 sps:$4 sm:$0xff]  }
 0x29c   :  { %4567 = vmatpush1.bf16.msra.mxu0 %v6527_v48  ;;  %v6602_v48 = vld [vmem:[#allocation10 + $0x88c] ss:$12 sps:$4 sm:$0xff]  }
 0x29d   :  { %4568 = vmatprep.subr.bf16.mxu0 %v6534_v50  ;;  %v6600_v50 = vld [vmem:[#allocation10 + $0x888] ss:$12 sps:$4 sm:$0xff]  }
 0x2a0   :  { %4569 = vmatpush1.bf16.msra.mxu0 %v6532_v51  ;;  %v6605_v51 = vld [vmem:[#allocation10 + $0x8a4] ss:$12 sps:$4 sm:$0xff]  }
 0x2a1   :  { %4570 = vmatprep.subr.bf16.mxu0 %v6539_v20  ;;  %v6603_v20 = vld [vmem:[#allocation10 + $0x8a0] ss:$12 sps:$4 sm:$0xff]  }
 0x2a4   :  { %4571 = vmatpush1.bf16.msra.mxu0 %v6537_v56  ;;  %v6608_v56 = vld [vmem:[#allocation10 + $0x8bc] ss:$12 sps:$4 sm:$0xff]  }
 0x2a5   :  { %4572 = vmatprep.subr.bf16.mxu0 %v6544_v14  ;;  %v6973_v14 = vld [vmem:[#allocation12] sm:$0x7] }
 0x2a8   :  { %4573 = vmatpush1.bf16.msra.mxu0 %v6542_v57  ;;  %v6606_v57 = vld [vmem:[#allocation10 + $0x8b8] ss:$12 sps:$4 sm:$0xff]  }
 0x2a9   :  { %4574 = vmatprep.subr.bf16.mxu0 %v6549_v59  ;;  %v6611_v59 = vld [vmem:[#allocation10 + $0x8d4] ss:$12 sps:$4 sm:$0xff]  }
 0x2ac   :  { %4575 = vmatpush1.bf16.msra.mxu0 %v6547_v63  ;;  %v2838_v63 = vrot.slane %v6973_v14, %v6928_v55 }
 0x2ad   :  { %4576 = vmatprep.subr.bf16.mxu0 %v6554_v1 }
 0x2b0   :  { %4577 = vmatpush1.bf16.msra.mxu0 %v6552_v2  ;;  %v2396_v6 = vpop.f32.mrb[12].mxu1  ;;  %v6609_v2 = vld [vmem:[#allocation10 + $0x8d0] ss:$12 sps:$4 sm:$0xff]  }
 0x2b1   :  { %v5734_v8 = vadd.f32 %v2396_v6, %v432_v58  ;;  %v2398_v9 = vpop.f32.mrb[13].mxu1  ;;  %4578 = vmatprep.subr.bf16.mxu0 %v6559_v4  ;;  %v6614_v4 = vld [vmem:[#allocation10 + $0x8ec] ss:$12 sps:$4 sm:$0xff]  }
 0x2b2   :  { %v5735_v11 = vadd.f32 %v2398_v9, %v436_v5  ;;  %v2400_v12 = vpop.f32.mrb[14].mxu1 }
 0x2b3   :  { %v2415_v15 = vmax.f32 %v5734_v8, 0.0  ;;  %v5736_v16 = vadd.f32 %v2400_v12, %v432_v58  ;;  %v2402_v52 = vpop.f32.mrb[15].mxu1  ;;  %v6612_v12 = vld [vmem:[#allocation10 + $0x8e8] ss:$12 sps:$4 sm:$0xff]  }
 0x2b4   :  { %v2416_v18 = vmax.f32 %v5735_v11, 0.0  ;;  %v5737_v19 = vadd.f32 %v2402_v52, %v436_v5  ;;  %4579 = vmatpush1.bf16.msra.mxu0 %v6557_v7 }
 0x2b5   :  { %v2427_v22 = vmax.f32 %v5736_v16, 0.0  ;;  %4580 = vmatprep.subr.bf16.mxu0 %v6564_v10 }
 0x2b6   :  { %v2428_v34 = vmax.f32 %v5737_v19, 0.0 }
 0x2b7   :  { %v6969_v3 = vpack.c.bf16 %v2427_v22, %v2415_v15 }
 0x2b8   :  { %v2440_v24 = vpack.c.bf16 %v2428_v34, %v2416_v18  ;;  %4581 = vmatpush1.bf16.msra.mxu0 %v6562_v21 }
 0x2b9   :  { %4593 = vmatprep.subr.bf16.mxu0 %v6569_v23 }
 0x2ba   :  { %4873 = vmatprep.mubr.bf16.mxu1 %v2440_v24 }
 0x2bb   :  { %4583 = vmatmul.mubr.bf16.vlgmr.msra.gmra.mrb[8].mxu0 %v6947_v60  ;;  %4874 = vmatmul.mubr.bf16.vlgmr.msra.gmra.mrb[36].mxu1 %v6969_v3  ;;  %v6582_v60 = vld [vmem:[#allocation10 + $0x7f8] ss:$12 sps:$4 sm:$0xff]  }
 0x2bc   :  { %4594 = vmatpush1.bf16.msra.mxu0 %v6567_v25  ;;  %4625 = vmatprep.mubr.bf16.mxu0 %v2440_v24 }
 0x2bd   :  { %4595 = vmatprep.subr.bf16.mxu0 %v6572_v61 }
 0x2c0   :  { %4596 = vmatpush1.bf16.msra.mxu0 %v6570_v26 }
 0x2c1   :  { %4597 = vmatprep.subr.bf16.mxu0 %v6575_v17 }
 0x2c4   :  { %4598 = vmatpush1.bf16.msra.mxu0 %v6573_v27 }
 0x2c5   :  { %4599 = vmatprep.subr.bf16.mxu0 %v6578_v28 }
 0x2c8   :  { %4600 = vmatpush1.bf16.msra.mxu0 %v6576_v62 }
 0x2c9   :  { %4601 = vmatprep.subr.bf16.mxu0 %v6581_v29 }
 0x2cc   :  { %4602 = vmatpush1.bf16.msra.mxu0 %v6579_v0 }
 0x2cd   :  { %4603 = vmatprep.subr.bf16.mxu0 %v6584_v30 }
 0x2d0   :  { %4604 = vmatpush1.bf16.msra.mxu0 %v6582_v60  ;;  %v5598_v13 = vpop.f32.mrb[16].mxu1 }
 0x2d1   :  { %v5599_v33 = vpop.f32.mrb[17].mxu1  ;;  %4605 = vmatprep.subr.bf16.mxu0 %v6587_v31 }
 0x2d2   :  { %v5600_v36 = vadd.f32 %v5599_v33, %v5598_v13  ;;  %v5601_v37 = vpop.f32.mrb[18].mxu1  ;;  %v4884_v33 = vadd.s32 8, %v6895_v49 }
 0x2d3   :  { %v5602_v38 = vpop.f32.mrb[19].mxu1 }
 0x2d4   :  { %4606 = vmatpush1.bf16.msra.mxu0 %v6585_v32  ;;  %v5603_v39 = vadd.f32 %v5602_v38, %v5601_v37  ;;  %v4671_v5 = vadd.f32 %v5600_v36, %v2838_v63  ;;  %v4890_v32 = vand.u32 127, %v389_v46  ;;  %v4893_v36 = vmul.u32 384, %v6895_v49 }
 0x2d5   :  { %4607 = vmatprep.subr.bf16.mxu0 %v6590_v35  ;;  %v4894_v37 = vmul.u32 384, %v4884_v33 }
 0x2d6   :  { %v4674_v9 = vadd.f32 %v5603_v39, %v2838_v63  ;;  %v4892_v35 = vadd.s32 256, %v4890_v32  ;;  %v4902_v39 = vstv %s7003_s0  ;;  %s6768_s0 = smov [#allocation13]  }
 0x2d7   :  { %s4992_s13 = sshll.u32 %s6768_s0, 4  ;;  %s4993_s13 = int_to_ptr.vmem [resolvable:$true] %s4992_s13 }
 0x2d8   :  { %4608 = vmatpush1.bf16.msra.mxu0 %v6588_v40  ;;  %v4897_v38 = vadd.s32 %v4893_v36, %v4892_v35  ;;  %v4900_v40 = vadd.s32 %v4894_v37, %v4892_v35  ;;  %s6726_s14 = scalar_lea.vmem %s4993_s13, 768  ;;  %p6731_p13 = scmp.lt.s32.totalorder %s4993_s13, %s4993_s13 }
 0x2d9   :  { %4609 = vmatprep.subr.bf16.mxu0 %v6593_v41  ;;  %p6727_p12 = scmp.ne.s32.totalorder %s4993_s13, %s6726_s14  ;;  %p6732_p0 = scmp.lt.s32.totalorder %s6726_s14, %s6726_s14 }
 0x2da   :  { %v4905_v41 = vxor.u32 %v4902_v39, %v4897_v38 }
 0x2db   :  { %p6733_p1 = por %p6732_p0, %p6731_p13 }
 0x2dc   :  { %4610 = vmatpush1.bf16.msra.mxu0 %v6591_v42  ;;  %v4908_v42 = vxor.u32 %v4902_v39, %v4900_v40 }
 0x2dd   :  { %4611 = vmatprep.subr.bf16.mxu0 %v6596_v43  ;;  %v4911_v43 = vmul.u32 2654435769, %v4905_v41  ;;  %p6734_p2 = pnand %p6733_p1, %p6727_p12 }
 0x2e0   :  { %4612 = vmatpush1.bf16.msra.mxu0 %v6594_v44  ;;  %v4914_v44 = vmul.u32 2654435769, %v4908_v42 }
 0x2e1   :  { %4613 = vmatprep.subr.bf16.mxu0 %v6599_v45  ;;  %v4917_v45 = vshrl.u32 %v4911_v43, 16 }
 0x2e4   :  { %4614 = vmatpush1.bf16.msra.mxu0 %v6597_v47  ;;  %v4920_v47 = vshrl.u32 %v4914_v44, 16 }
 0x2e5   :  { %4615 = vmatprep.subr.bf16.mxu0 %v6602_v48  ;;  %v4923_v48 = vxor.u32 %v4917_v45, %v4911_v43 }
 0x2e6   :  { %v4926_v46 = vxor.u32 %v4920_v47, %v4914_v44 }
 0x2e8   :  { %4616 = vmatpush1.bf16.msra.mxu0 %v6600_v50  ;;  %v4929_v50 = vmul.u32 2146121005, %v4923_v48 }
 0x2e9   :  { %4617 = vmatprep.subr.bf16.mxu0 %v6605_v51  ;;  %v4932_v51 = vmul.u32 2146121005, %v4926_v46 }
 0x2ec   :  { %4618 = vmatpush1.bf16.msra.mxu0 %v6603_v20  ;;  %v4935_v20 = vshrl.u32 %v4929_v50, 15 }
 0x2ed   :  { %4619 = vmatprep.subr.bf16.mxu0 %v6608_v56  ;;  %v4938_v56 = vshrl.u32 %v4932_v51, 15 }
 0x2ee   :  { %v4941_v49 = vxor.u32 %v4935_v20, %v4929_v50 }
 0x2f0   :  { %4620 = vmatpush1.bf16.msra.mxu0 %v6606_v57  ;;  %v5620_v1 = vpop.f32.mrb[20].mxu1  ;;  %v4944_v57 = vxor.u32 %v4938_v56, %v4932_v51  ;;  %v2830_v56 = vrot.slane %v6973_v14, %v6900_v53 }
 0x2f1   :  { %v5621_v58 = vpop.f32.mrb[21].mxu1  ;;  %4621 = vmatprep.subr.bf16.mxu0 %v6611_v59  ;;  %v4947_v59 = vmul.u32 2221713035, %v4941_v49 }
 0x2f2   :  { %v5622_v6 = vadd.f32 %v5621_v58, %v5620_v1  ;;  %v5623_v7 = vpop.f32.mrb[22].mxu1  ;;  %v4950_v63 = vmul.u32 2221713035, %v4944_v57 }
 0x2f3   :  { %v5624_v8 = vpop.f32.mrb[23].mxu1  ;;  %v4953_v1 = vshrl.u32 %v4947_v59, 16 }
 0x2f4   :  { %v4712_v10 = vadd.f32 %v5622_v6, %v4671_v5  ;;  %4622 = vmatpush1.bf16.msra.mxu0 %v6609_v2  ;;  %v5625_v11 = vadd.f32 %v5624_v8, %v5623_v7  ;;  %v4956_v2 = vshrl.u32 %v4950_v63, 16 }
 0x2f5   :  { %4623 = vmatprep.subr.bf16.mxu0 %v6614_v4  ;;  %v4959_v5 = vxor.u32 %v4953_v1, %v4947_v59  ;;  %v2834_v59 = vrot.slane %v6973_v14, %v6903_v54 }
 0x2f6   :  { %v4715_v15 = vadd.f32 %v5625_v11, %v4674_v9  ;;  %v4962_v9 = vxor.u32 %v4956_v2, %v4950_v63 }
 0x2f7   :  { %vm4965_vm0 = vcmp.ge.u32.totalorder %v4959_v5, 858993459 }
 0x2f8   :  { %4624 = vmatpush1.bf16.msra.mxu0 %v6612_v12  ;;  %vm4968_vm1 = vcmp.ge.u32.totalorder %v4962_v9, 858993459 }
 0x2fb   :  { %4626 = vmatmul.mubr.bf16.vlgmr.msra.gmra.mrb[8].mxu0 %v6969_v3 }
 0x310   :  { %v5642_v55 = vpop.f32.mrb[24].mxu1 }
 0x311   :  { %v5643_v16 = vpop.f32.mrb[25].mxu1 }
 0x312   :  { %v5644_v52 = vadd.f32 %v5643_v16, %v5642_v55  ;;  %v5645_v18 = vpop.f32.mrb[26].mxu1 }
 0x313   :  { %v5646_v19 = vpop.f32.mrb[27].mxu1 }
 0x314   :  { %v4753_v21 = vadd.f32 %v5644_v52, %v4712_v10  ;;  %v5647_v22 = vadd.f32 %v5646_v19, %v5645_v18  ;;  %v4891_v18 = vadd.s32 128, %v4890_v32  ;;  %v4895_v19 = vadd.s32 %v4893_v36, %v4890_v32 }
 0x316   :  { %v4756_v23 = vadd.f32 %v5647_v22, %v4715_v15  ;;  %v4898_v22 = vadd.s32 %v4894_v37, %v4890_v32 }
 0x330   :  { %v5664_v34 = vpop.f32.mrb[28].mxu1 }
 0x331   :  { %v5665_v24 = vpop.f32.mrb[29].mxu1 }
 0x332   :  { %v5666_v25 = vadd.f32 %v5665_v24, %v5664_v34  ;;  %v5667_v61 = vpop.f32.mrb[30].mxu1  ;;  %v4903_v34 = vxor.u32 %v4902_v39, %v4895_v19 }
 0x333   :  { %v5668_v26 = vpop.f32.mrb[31].mxu1 }
 0x334   :  { %v4794_v17 = vadd.f32 %v5666_v25, %v4753_v21  ;;  %v5669_v27 = vadd.f32 %v5668_v26, %v5667_v61  ;;  %v4896_v21 = vadd.s32 %v4893_v36, %v4891_v18  ;;  %v4906_v25 = vxor.u32 %v4902_v39, %v4898_v22 }
 0x335   :  { %v4909_v26 = vmul.u32 2654435769, %v4903_v34 }
 0x336   :  { %v4797_v28 = vadd.f32 %v5669_v27, %v4756_v23  ;;  %v4899_v23 = vadd.s32 %v4894_v37, %v4891_v18  ;;  %v4904_v24 = vxor.u32 %v4902_v39, %v4896_v21  ;;  %v4912_v27 = vmul.u32 2654435769, %v4906_v25 }
 0x338   :  { %v4907_v61 = vxor.u32 %v4902_v39, %v4899_v23 }
 0x350   :  { %v5686_v62 = vpop.f32.mrb[32].mxu1 }
 0x351   :  { %v5687_v29 = vpop.f32.mrb[33].mxu1 }
 0x352   :  { %v5688_v0 = vadd.f32 %v5687_v29, %v5686_v62  ;;  %v5689_v3 = vpop.f32.mrb[34].mxu1  ;;  %v4915_v62 = vshrl.u32 %v4909_v26, 16 }
 0x353   :  { %v5690_v30 = vpop.f32.mrb[35].mxu1 }
 0x354   :  { %v4835_v60 = vadd.f32 %v5688_v0, %v4794_v17  ;;  %v5691_v31 = vadd.f32 %v5690_v30, %v5689_v3  ;;  %v4910_v17 = vmul.u32 2654435769, %v4904_v24  ;;  %v4918_v0 = vshrl.u32 %v4912_v27, 16 }
 0x355   :  { %v4921_v30 = vxor.u32 %v4915_v62, %v4909_v26 }
 0x356   :  { %v4838_v13 = vadd.f32 %v5691_v31, %v4797_v28  ;;  %v4913_v28 = vmul.u32 2654435769, %v4907_v61  ;;  %v4916_v29 = vshrl.u32 %v4910_v17, 16  ;;  %v4924_v31 = vxor.u32 %v4918_v0, %v4912_v27 }
 0x357   :  { %v4927_v33 = vmul.u32 2146121005, %v4921_v30 }
 0x358   :  { %v4919_v3 = vshrl.u32 %v4913_v28, 16  ;;  %v4930_v32 = vmul.u32 2146121005, %v4924_v31 }
 0x359   :  { %v4933_v37 = vshrl.u32 %v4927_v33, 15 }
 0x35a   :  { %v4936_v40 = vshrl.u32 %v4930_v32, 15 }
 0x35b   :  { %v4939_v41 = vxor.u32 %v4933_v37, %v4927_v33 }
 0x35c   :  { %v4942_v43 = vxor.u32 %v4936_v40, %v4930_v32 }
 0x35d   :  { %v4945_v45 = vmul.u32 2221713035, %v4939_v41 }
 0x35e   :  { %v4948_v48 = vmul.u32 2221713035, %v4942_v43 }
 0x35f   :  { %v4951_v50 = vshrl.u32 %v4945_v45, 16 }
 0x360   :  { %v4954_v20 = vshrl.u32 %v4948_v48, 16 }
 0x361   :  { %v4957_v57 = vxor.u32 %v4951_v50, %v4945_v45 }
 0x362   :  { %v4960_v2 = vxor.u32 %v4954_v20, %v4948_v48 }
 0x363   :  { %vm4963_vm2 = vcmp.ge.u32.totalorder %v4957_v57, 858993459 }
 0x364   :  { %vm4966_vm4 = vcmp.ge.u32.totalorder %v4960_v2, 858993459 }
 0x38e   :  { %v5708_v58 = vpop.f32.mrb[36].mxu1 }
 0x38f   :  { %v5709_v4 = vpop.f32.mrb[37].mxu1 }
 0x390   :  { %v5710_v6 = vadd.f32 %v5709_v4, %v5708_v58  ;;  %v5711_v7 = vpop.f32.mrb[38].mxu1 }
 0x391   :  { %v5712_v8 = vpop.f32.mrb[39].mxu1 }
 0x392   :  { %v4876_v10 = vadd.f32 %v5710_v6, %v4835_v60  ;;  %v5713_v11 = vadd.f32 %v5712_v8, %v5711_v7  ;;  %v4922_v60 = vxor.u32 %v4916_v29, %v4910_v17 }
 0x394   :  { %v4971_v12 = vmul.f32 1.25, %v4876_v10  ;;  %v4879_v15 = vadd.f32 %v5713_v11, %v4838_v13  ;;  %v4925_v13 = vxor.u32 %v4919_v3, %v4913_v28  ;;  %v4928_v35 = vmul.u32 2146121005, %v4922_v60 }
 0x396   :  { %v4977_v55 = vsel %vm4965_vm0, %v4971_v12, 0.0  ;;  %v4974_v16 = vmul.f32 1.25, %v4879_v15  ;;  %v4931_v36 = vmul.u32 2146121005, %v4925_v13  ;;  %v4934_v38 = vshrl.u32 %v4928_v35, 15 }
 0x397   :  { %4983 = vst [vmem:[#allocation13 + $0x10] sm:$0xff] %v4977_v55 }
 0x398   :  { %v4980_v52 = vsel %vm4968_vm1, %v4974_v16, 0.0  ;;  %v4937_v39 = vshrl.u32 %v4931_v36, 15  ;;  %v4940_v42 = vxor.u32 %v4934_v38, %v4928_v35 }
 0x399   :  { %4986 = vst [vmem:[#allocation13 + $0x28] sm:$0xff] %v4980_v52 }
 0x39a   :  { %v4943_v44 = vxor.u32 %v4937_v39, %v4931_v36  ;;  %v4946_v47 = vmul.u32 2221713035, %v4940_v42 }
 0x39c   :  { %v4949_v46 = vmul.u32 2221713035, %v4943_v44  ;;  %v4952_v51 = vshrl.u32 %v4946_v47, 16 }
 0x39e   :  { %v4955_v49 = vshrl.u32 %v4949_v46, 16  ;;  %v4958_v63 = vxor.u32 %v4952_v51, %v4946_v47 }
 0x3a0   :  { %v4961_v5 = vxor.u32 %v4955_v49, %v4949_v46  ;;  %vm4964_vm3 = vcmp.ge.u32.totalorder %v4958_v63, 858993459 }
 0x3a2   :  { %vm4967_vm5 = vcmp.ge.u32.totalorder %v4961_v5, 858993459 }
 0x3ce   :  { %v4627_v1 = vpop.f32.mrb[8].mxu0 }
 0x3cf   :  { %v5738_v58 = vadd.f32 %v4627_v1, %v2830_v56  ;;  %v4629_v4 = vpop.f32.mrb[9].mxu0 }
 0x3d0   :  { %v5739_v6 = vadd.f32 %v4629_v4, %v2834_v59  ;;  %v4631_v7 = vpop.f32.mrb[10].mxu0 }
 0x3d1   :  { %v4969_v8 = vmul.f32 1.25, %v5738_v58  ;;  %v5740_v9 = vadd.f32 %v4631_v7, %v2830_v56  ;;  %v4633_v10 = vpop.f32.mrb[11].mxu0 }
 0x3d2   :  { %v4970_v11 = vmul.f32 1.25, %v5739_v6  ;;  %v5741_v53 = vadd.f32 %v4633_v10, %v2834_v59 }
 0x3d3   :  { %v4975_v12 = vsel %vm4963_vm2, %v4969_v8, 0.0  ;;  %v4972_v54 = vmul.f32 1.25, %v5740_v9 }
 0x3d4   :  { %4981 = vst [vmem:[#allocation13] sm:$0xff] %v4975_v12  ;;  %v4976_v14 = vsel %vm4964_vm3, %v4970_v11, 0.0  ;;  %v4973_v15 = vmul.f32 1.25, %v5741_v53 }
 0x3d5   :  { %4982 = vst [vmem:[#allocation13 + $0x8] sm:$0xff] %v4976_v14  ;;  %v4978_v55 = vsel %vm4966_vm4, %v4972_v54, 0.0 }
 0x3d6   :  { %4984 = vst [vmem:[#allocation13 + $0x18] sm:$0xff] %v4978_v55  ;;  %v4979_v16 = vsel %vm4967_vm5, %v4973_v15, 0.0 }
 0x3d7   :  { %4985 = vst [vmem:[#allocation13 + $0x20] sm:$0xff] %v4979_v16 }
 0x3d8   :  { %6737 = shalt.err (!%p6734_p2)
}
 0x3d9   :  { %s6738_s17 = scalar_lea.hbm %s7009_s6, 768 }
 0x3da   :  { %p6739_p3 = scmp.ne.s32.totalorder %s7009_s6, %s6738_s17  ;;  %p6742_p4 = scmp.lt.u32.totalorder %s6738_s17, %s7009_s6 }
 0x3dc   :  { %p6744_p5 = pnand %p6742_p4, %p6739_p3 }
 0x3de   :  { %6747 = shalt.err (!%p6744_p5)
}
 0x3df   :  { %4998 = dma.vmem_to_hbm [thread:$0]  %s4993_s13, 768, %s7009_s6, [#allocation6], %s6763_s4, %s6763_s4, %s6764_s10  }
 0x3e0   :  { %6754 = dma.done.wait [#allocation6], 768  }
 0x3e1   :  { %6755 = vsyncadd [#allocation6], 4294966528 }
 0x3e2   :  { %5002 = vsyncpa [#allocation5], 1 }
 0x3e3   :  { %5003 = vsyncpa [#allocation8], 1 }
 0x3e4   :  { %5004 = vsyncpa [#allocation11], 1 }
 0x3e5   :  { %5005 = vsyncpa [#allocation6], 1 }

</bundles_post_ra>
